<compile_context>
chip_gen: v5e
topology: v5e:2x2
jax: 0.10.0
libtpu: 0.0.40
codegen_flags: <defaults>
</compile_context>

<pallas_src>
import functools

import jax
import jax.numpy as jnp
from jax.experimental import pallas as pl
from jax.experimental.pallas import tpu as pltpu

EPS = 1e-5


def _round_up(x, m):
    return ((x + m - 1) // m) * m


# ----------------------------------------------------------------------------
# Fused Pallas kernel.
# Inputs : (L, TILE_R) blocks of true / pred (time on sublanes, rows on lanes).
# Output : one (1, 8, TILE_R) lane-dense slab of per-block partial sums:
#   sublane 0: sum over patches of (1 - patch_linear_corr)        per row
#   sublane 1: sum over patches of KL(softmax(true)||softmax(pred)).sum(patch)
#   sublane 2: sum over patches of |patch_mean_true - patch_mean_pred|
#   sublane 3: per-series linear_sim * var_sim  (for the gamma weight)
#   sublane 4: per-series sum((pred - true)^2)  (for the MSE term)
#   sublanes 5..7: zero padding
# ----------------------------------------------------------------------------
def _fused_ps_kernel(tr_ref, pr_ref, stats_ref,
                     *, n_rows, tile_r, series_len, patch_len, stride,
                     num_patches):
    b = pl.program_id(0)
    lane = jax.lax.broadcasted_iota(jnp.int32, (1, tile_r), 1)
    valid = ((b * tile_r + lane) < n_rows).astype(jnp.float32)

    tr = tr_ref[...]          # (L, TILE_R)
    pr = pr_ref[...]

    # ---- per-series similarity stats + squared error (whole series) ----
    inv_l = 1.0 / series_len
    tm = jnp.sum(tr, axis=0, keepdims=True) * inv_l
    pm = jnp.sum(pr, axis=0, keepdims=True) * inv_l
    td = tr - tm
    pd = pr - pm
    tv = jnp.sum(td * td, axis=0, keepdims=True) * inv_l
    pv = jnp.sum(pd * pd, axis=0, keepdims=True) * inv_l
    cov = jnp.sum(td * pd, axis=0, keepdims=True) * inv_l
    std_prod = jnp.sqrt(tv * pv)                       # == true_std * pred_std
    lin = (cov + EPS) * pl.reciprocal(std_prod + EPS, approx=True)
    lin = (1.0 + lin) * 0.5
    vsim = (2.0 * std_prod + EPS) * pl.reciprocal(tv + pv + EPS, approx=True)
    diff = pr - tr
    row_sim = lin * vsim * valid                       # (1, TILE_R)
    row_sq = jnp.sum(diff * diff, axis=0, keepdims=True) * valid

    # ---- patch-wise structural terms (in-kernel overlapping windows) ----
    inv_p = 1.0 / patch_len
    corr_acc = jnp.zeros((1, tile_r), jnp.float32)
    kl_acc = jnp.zeros((1, tile_r), jnp.float32)
    mean_acc = jnp.zeros((1, tile_r), jnp.float32)
    for n in range(num_patches):                       # small, unrolled
        s = n * stride
        tp = tr_ref[s:s + patch_len, :]                # (P, TILE_R) static slice
        pp = pr_ref[s:s + patch_len, :]

        tpm = jnp.sum(tp, axis=0, keepdims=True) * inv_p
        ppm = jnp.sum(pp, axis=0, keepdims=True) * inv_p
        tpd = tp - tpm
        ppd = pp - ppm
        tpv = jnp.sum(tpd * tpd, axis=0, keepdims=True) * inv_p
        ppv = jnp.sum(ppd * ppd, axis=0, keepdims=True) * inv_p
        pcov = jnp.sum(tpd * ppd, axis=0, keepdims=True) * inv_p
        p_std_prod = jnp.sqrt(tpv * ppv)
        corr = (pcov + EPS) * pl.reciprocal(p_std_prod + EPS, approx=True)
        corr_acc = corr_acc + (1.0 - corr)

        # KLDivLoss(log_softmax(pred), softmax(true)) = q*(log q - log p),
        # summed over the patch dim (reduction='none' then .sum(-1) in torch).
        # Done fully in log-space (exp / log live on the EUP slot).
        t_shift = tp - jnp.max(tp, axis=0, keepdims=True)
        p_shift = pp - jnp.max(pp, axis=0, keepdims=True)
        t_lse = jnp.log(jnp.sum(jnp.exp(t_shift), axis=0, keepdims=True))
        p_lse = jnp.log(jnp.sum(jnp.exp(p_shift), axis=0, keepdims=True))
        t_lsm = t_shift - t_lse
        p_lsm = p_shift - p_lse
        t_sm = jnp.exp(t_lsm)
        kl_acc = kl_acc + jnp.sum(t_sm * (t_lsm - p_lsm), axis=0, keepdims=True)

        mean_acc = mean_acc + jnp.abs(tpm - ppm)

    # ---- single (8, TILE_R)-aligned write-back per block ----
    stats = jnp.concatenate(
        [corr_acc * valid,
         kl_acc * valid,
         mean_acc * valid,
         row_sim,
         row_sq,
         jnp.zeros((3, tile_r), jnp.float32)],
        axis=0)                                        # (8, TILE_R)
    stats_ref[...] = stats[None]                       # (1, 8, TILE_R)


def fused_ps_stats(true_rows, pred_rows, patch_len, stride,
                   vmem_budget_bytes=12 * 1024 * 1024):
    """true_rows/pred_rows: (R, L) float32. Returns 5 scalar sums + n_patches."""
    R, L = true_rows.shape
    num_patches = (L - patch_len) // stride + 1

    # Row-tile sized so 2 inputs x 2 pipeline buffers x (L, TILE_R) x 4B fits
    # comfortably in scoped VMEM on every generation (v7x physical = 64 MiB).
    per_lane_bytes = 2 * 2 * L * 4
    max_tile = max(128, (vmem_budget_bytes // per_lane_bytes) // 128 * 128)
    tile_r = min(max_tile, _round_up(R, 128))
    padded_r = _round_up(R, tile_r)
    num_blocks = padded_r // tile_r

    # (R, L) -> (L, padded_R): rows on lanes (padded to a 128 multiple).
    def to_lanes(x):
        x = jnp.transpose(x.astype(jnp.float32), (1, 0))
        return jnp.pad(x, ((0, 0), (0, padded_r - R)))

    tr = to_lanes(true_rows)
    pr = to_lanes(pred_rows)

    kernel = functools.partial(
        _fused_ps_kernel, n_rows=R, tile_r=tile_r, series_len=L,
        patch_len=patch_len, stride=stride, num_patches=num_patches)

    in_spec = pl.BlockSpec((L, tile_r), lambda b: (0, b))
    out_spec = pl.BlockSpec((1, 8, tile_r), lambda b: (b, 0, 0))
    out_shape = jax.ShapeDtypeStruct((num_blocks, 8, tile_r), jnp.float32)

    stats = pl.pallas_call(
        kernel,
        out_shape=out_shape,
        grid_spec=pltpu.PrefetchScalarGridSpec(
            num_scalar_prefetch=0,
            grid=(num_blocks,),
            in_specs=[in_spec, in_spec],
            out_specs=out_spec,
        ),
        compiler_params=pltpu.CompilerParams(
            dimension_semantics=("parallel",),      # megacore / v7x 2nd TC
            vmem_limit_bytes=32 * 1024 * 1024),
    )(tr, pr)

    sums = jnp.sum(stats, axis=(0, 2))              # (8,)
    corr_sum, kl_sum, mean_sum, sim_sum, sq_sum = (
        sums[0], sums[1], sums[2], sums[3], sums[4])
    return corr_sum, kl_sum, mean_sum, sim_sum, sq_sum, num_patches


# ----------------------------------------------------------------------------
# Plain-JAX glue (FFT-based patch sizing, reference losses for the weights).
# ----------------------------------------------------------------------------
def create_patches(x_blc, patch_len, stride):
    """(B, L, C) -> (B, C, num_patches, patch_len)  == torch unfold (one gather)."""
    x = jnp.transpose(x_blc, (0, 2, 1))                       # (B, C, L)
    L = x.shape[-1]
    n = (L - patch_len) // stride + 1
    idx = jnp.arange(n)[:, None] * stride + jnp.arange(patch_len)[None, :]
    return x[:, :, idx]                                       # (B, C, n, P)


def adaptive_patch_params(true_blc, patch_len_threshold):
    # TODO(synk): rfft/argmax (data-dependent static patch size) has no Pallas
    # primitive; computed eagerly in plain JAX, result used as static shape.
    fft = jnp.fft.rfft(true_blc, axis=1)
    freq = jnp.abs(fft).mean(axis=0).mean(axis=-1)
    freq = freq.at[0].set(0.0)
    top = int(jnp.argmax(freq))
    L = true_blc.shape[1]
    period = L // top
    patch_len = int(min(period // 2, patch_len_threshold))
    stride = patch_len // 2
    return patch_len, stride


def structural_losses_ref(true_patch, pred_patch):
    """Differentiable pure-JAX mirror of the patch loss (used only for grads)."""
    tm = jnp.mean(true_patch, -1, keepdims=True)
    pm = jnp.mean(pred_patch, -1, keepdims=True)
    tv = jnp.mean((true_patch - tm) ** 2, -1, keepdims=True)
    pv = jnp.mean((pred_patch - pm) ** 2, -1, keepdims=True)
    ts, psd = jnp.sqrt(tv), jnp.sqrt(pv)
    cov = jnp.mean((true_patch - tm) * (pred_patch - pm), -1, keepdims=True)
    corr = (cov + EPS) / (ts * psd + EPS)
    corr_loss = jnp.mean(1.0 - corr)
    t_sm = jax.nn.softmax(true_patch, -1)
    t_lsm = jax.nn.log_softmax(true_patch, -1)
    p_lsm = jax.nn.log_softmax(pred_patch, -1)
    var_loss = jnp.mean(jnp.sum(t_sm * (t_lsm - p_lsm), -1))
    mean_loss = jnp.mean(jnp.abs(tm - pm))
    return corr_loss, var_loss, mean_loss


def head_apply(W, b, x_in):
    """Synthetic forecasting head (e.g. DLinear Linear_Trend): Linear(S -> L)."""
    y = jnp.einsum("bcs,ls->bcl", x_in, W) + b       # (B, C, L)
    return jnp.transpose(y, (0, 2, 1))               # (B, L, C)


def dynamic_weights(W, b, x_in, label, patch_len, stride, mean_sim):
    # TODO(synk): torch.autograd.grad w.r.t. head parameters has no Pallas
    # equivalent; the (detached scalar) weights come from a single jax.jacrev
    # pass (one forward, stacked-cotangent backward) over the pure-JAX mirror.
    true_patch = create_patches(label, patch_len, stride)

    def losses(w):
        pred = head_apply(w, b, x_in)
        pred_patch = create_patches(pred, patch_len, stride)
        return jnp.stack(structural_losses_ref(true_patch, pred_patch))

    jac = jax.jacrev(losses)(W)                      # (3, L, S)
    g_c, g_v, g_m = jac[0], jac[1], jac[2]
    g_avg = (g_c + g_v + g_m) / 3.0
    n_avg = jnp.linalg.norm(g_avg)
    alpha = n_avg / jnp.linalg.norm(g_c)
    beta = n_avg / jnp.linalg.norm(g_v)
    gamma = n_avg / jnp.linalg.norm(g_m) * mean_sim
    return alpha, beta, gamma


if __name__ == "__main__":
    key = jax.random.PRNGKey(0)
    B, C, S, L = 2, 4, 8, 16          # batch, channels, head input len, horizon
    PATCH_LEN_THRESHOLD = 8           # args.patch_len_threshold
    PS_LAMBDA = 0.5                   # args.alpha

    k1, k2, k3, k4 = jax.random.split(key, 4)
    W = 0.1 * jax.random.normal(k1, (L, S), jnp.float32)       # head weight
    bias = 0.01 * jax.random.normal(k2, (L,), jnp.float32)     # head bias
    x_in = jax.random.normal(k3, (B, C, S), jnp.float32)       # head input

    # Label: dominant sinusoid of period 8 + small noise -> deterministic
    # FFT-based patching (patch_len = 4, stride = 2).
    t_idx = jnp.arange(L, dtype=jnp.float32)
    base = jnp.sin(2.0 * jnp.pi * t_idx / 8.0)[None, :, None]
    label = base + 0.1 * jax.random.normal(k4, (B, L, C), jnp.float32)

    pred = head_apply(W, bias, x_in)                            # (B, L, C)

    # --- Fourier based adaptive patching (glue, static ints) ---
    patch_len, stride = adaptive_patch_params(label, PATCH_LEN_THRESHOLD)

    # --- fused Pallas kernel: one HBM pass over true/pred series rows ---
    true_rows = jnp.transpose(label, (0, 2, 1)).reshape(B * C, L)
    pred_rows = jnp.transpose(pred, (0, 2, 1)).reshape(B * C, L)
    (corr_sum, kl_sum, mean_sum, sim_sum, sq_sum,
     num_patches) = fused_ps_stats(true_rows, pred_rows, patch_len, stride)

    R = B * C
    M = R * num_patches                  # total number of patches
    corr_loss = corr_sum / M
    var_loss = kl_sum / M                # KLDivLoss(reduction='none').sum(-1).mean()
    mean_loss = mean_sum / M
    mean_sim = sim_sum / R
    mse = sq_sum / (B * L * C)

    # --- gradient based dynamic weighting (detached scalars) ---
    alpha, beta, gamma = dynamic_weights(W, bias, x_in, label,
                                         patch_len, stride, mean_sim)

    ps = alpha * corr_loss + beta * var_loss + gamma * mean_loss
    loss = mse + PS_LAMBDA * ps
    jax.block_until_ready(loss)
    print("KERNEL_OK")
</pallas_src>

<mosaic_0001>
module attributes {stable_mosaic.version = 11 : i64} {
  func.func @_fused_ps_kernel(%arg0: i32, %arg1: memref<16x128xf32, #tpu.memory_space<vmem>>, %arg2: memref<16x128xf32, #tpu.memory_space<vmem>>, %arg3: memref<1x8x128xf32, #tpu.memory_space<vmem>>) attributes {dimension_semantics = [#tpu.dimension_semantics<parallel>], iteration_bounds = array<i64: 1>, scalar_prefetch = 0 : i64, scratch_operands = 0 : i64, tpu.core_type = #tpu.core_type<tc>, window_params = [{transform_indices = @transform_0, window_bounds = array<i64: 16, 128>}, {transform_indices = @transform_1, window_bounds = array<i64: 16, 128>}, {transform_indices = @transform_2, window_bounds = array<i64: 1, 8, 128>}]} {
    %0 = tpu.iota {dimensions = array<i32: 1>} : vector<1x128xi32>
    %c128_i32 = arith.constant 128 : i32
    %1 = arith.muli %arg0, %c128_i32 : i32
    %2 = vector.broadcast %1 : i32 to vector<1x128xi32>
    %3 = arith.addi %2, %0 : vector<1x128xi32>
    %c8_i32 = arith.constant 8 : i32
    %4 = vector.broadcast %c8_i32 : i32 to vector<1x128xi32>
    %5 = arith.cmpi slt, %3, %4 : vector<1x128xi32>
    %6 = arith.extui %5 : vector<1x128xi1> to vector<1x128xi32>
    %7 = arith.sitofp %6 : vector<1x128xi32> to vector<1x128xf32>
    %c0 = arith.constant 0 : index
    %c0_0 = arith.constant 0 : index
    %8 = vector.load %arg1[%c0, %c0_0] : memref<16x128xf32, #tpu.memory_space<vmem>>, vector<16x128xf32>
    %c0_1 = arith.constant 0 : index
    %c0_2 = arith.constant 0 : index
    %9 = vector.load %arg2[%c0_1, %c0_2] : memref<16x128xf32, #tpu.memory_space<vmem>>, vector<16x128xf32>
    %cst = arith.constant dense<0.000000e+00> : vector<128xf32>
    %10 = vector.multi_reduction <add>, %8, %cst [0] : vector<16x128xf32> to vector<128xf32>
    %11 = vector.shape_cast %10 : vector<128xf32> to vector<1x128xf32>
    %cst_3 = arith.constant 6.250000e-02 : f32
    %12 = vector.broadcast %cst_3 : f32 to vector<1x128xf32>
    %13 = arith.mulf %11, %12 : vector<1x128xf32>
    %cst_4 = arith.constant dense<0.000000e+00> : vector<128xf32>
    %14 = vector.multi_reduction <add>, %9, %cst_4 [0] : vector<16x128xf32> to vector<128xf32>
    %15 = vector.shape_cast %14 : vector<128xf32> to vector<1x128xf32>
    %cst_5 = arith.constant 6.250000e-02 : f32
    %16 = vector.broadcast %cst_5 : f32 to vector<1x128xf32>
    %17 = arith.mulf %15, %16 : vector<1x128xf32>
    %18 = vector.broadcast %13 : vector<1x128xf32> to vector<16x128xf32>
    %19 = arith.subf %8, %18 : vector<16x128xf32>
    %20 = vector.broadcast %17 : vector<1x128xf32> to vector<16x128xf32>
    %21 = arith.subf %9, %20 : vector<16x128xf32>
    %22 = arith.mulf %19, %19 : vector<16x128xf32>
    %cst_6 = arith.constant dense<0.000000e+00> : vector<128xf32>
    %23 = vector.multi_reduction <add>, %22, %cst_6 [0] : vector<16x128xf32> to vector<128xf32>
    %24 = vector.shape_cast %23 : vector<128xf32> to vector<1x128xf32>
    %cst_7 = arith.constant 6.250000e-02 : f32
    %25 = vector.broadcast %cst_7 : f32 to vector<1x128xf32>
    %26 = arith.mulf %24, %25 : vector<1x128xf32>
    %27 = arith.mulf %21, %21 : vector<16x128xf32>
    %cst_8 = arith.constant dense<0.000000e+00> : vector<128xf32>
    %28 = vector.multi_reduction <add>, %27, %cst_8 [0] : vector<16x128xf32> to vector<128xf32>
    %29 = vector.shape_cast %28 : vector<128xf32> to vector<1x128xf32>
    %cst_9 = arith.constant 6.250000e-02 : f32
    %30 = vector.broadcast %cst_9 : f32 to vector<1x128xf32>
    %31 = arith.mulf %29, %30 : vector<1x128xf32>
    %32 = arith.mulf %19, %21 : vector<16x128xf32>
    %cst_10 = arith.constant dense<0.000000e+00> : vector<128xf32>
    %33 = vector.multi_reduction <add>, %32, %cst_10 [0] : vector<16x128xf32> to vector<128xf32>
    %34 = vector.shape_cast %33 : vector<128xf32> to vector<1x128xf32>
    %cst_11 = arith.constant 6.250000e-02 : f32
    %35 = vector.broadcast %cst_11 : f32 to vector<1x128xf32>
    %36 = arith.mulf %34, %35 : vector<1x128xf32>
    %37 = arith.mulf %26, %31 : vector<1x128xf32>
    %38 = math.sqrt %37 : vector<1x128xf32>
    %cst_12 = arith.constant 9.99999974E-6 : f32
    %39 = vector.broadcast %cst_12 : f32 to vector<1x128xf32>
    %40 = arith.addf %36, %39 : vector<1x128xf32>
    %cst_13 = arith.constant 9.99999974E-6 : f32
    %41 = vector.broadcast %cst_13 : f32 to vector<1x128xf32>
    %42 = arith.addf %38, %41 : vector<1x128xf32>
    %43 = tpu.reciprocal %42 {approx = true} : vector<1x128xf32> -> vector<1x128xf32>
    %44 = arith.mulf %40, %43 : vector<1x128xf32>
    %cst_14 = arith.constant 1.000000e+00 : f32
    %45 = vector.broadcast %cst_14 : f32 to vector<1x128xf32>
    %46 = arith.addf %45, %44 : vector<1x128xf32>
    %cst_15 = arith.constant 5.000000e-01 : f32
    %47 = vector.broadcast %cst_15 : f32 to vector<1x128xf32>
    %48 = arith.mulf %46, %47 : vector<1x128xf32>
    %cst_16 = arith.constant 2.000000e+00 : f32
    %49 = vector.broadcast %cst_16 : f32 to vector<1x128xf32>
    %50 = arith.mulf %49, %38 : vector<1x128xf32>
    %cst_17 = arith.constant 9.99999974E-6 : f32
    %51 = vector.broadcast %cst_17 : f32 to vector<1x128xf32>
    %52 = arith.addf %50, %51 : vector<1x128xf32>
    %53 = arith.addf %26, %31 : vector<1x128xf32>
    %cst_18 = arith.constant 9.99999974E-6 : f32
    %54 = vector.broadcast %cst_18 : f32 to vector<1x128xf32>
    %55 = arith.addf %53, %54 : vector<1x128xf32>
    %56 = tpu.reciprocal %55 {approx = true} : vector<1x128xf32> -> vector<1x128xf32>
    %57 = arith.mulf %52, %56 : vector<1x128xf32>
    %58 = arith.subf %9, %8 : vector<16x128xf32>
    %59 = arith.mulf %48, %57 : vector<1x128xf32>
    %60 = arith.mulf %59, %7 : vector<1x128xf32>
    %61 = arith.mulf %58, %58 : vector<16x128xf32>
    %cst_19 = arith.constant dense<0.000000e+00> : vector<128xf32>
    %62 = vector.multi_reduction <add>, %61, %cst_19 [0] : vector<16x128xf32> to vector<128xf32>
    %63 = vector.shape_cast %62 : vector<128xf32> to vector<1x128xf32>
    %64 = arith.mulf %63, %7 : vector<1x128xf32>
    %cst_20 = arith.constant 0.000000e+00 : f32
    %65 = vector.broadcast %cst_20 : f32 to vector<1x128xf32>
    %cst_21 = arith.constant 0.000000e+00 : f32
    %66 = vector.broadcast %cst_21 : f32 to vector<1x128xf32>
    %cst_22 = arith.constant 0.000000e+00 : f32
    %67 = vector.broadcast %cst_22 : f32 to vector<1x128xf32>
    %c0_23 = arith.constant 0 : index
    %c0_24 = arith.constant 0 : index
    %68 = vector.load %arg1[%c0_23, %c0_24] : memref<16x128xf32, #tpu.memory_space<vmem>>, vector<4x128xf32>
    %c0_25 = arith.constant 0 : index
    %c0_26 = arith.constant 0 : index
    %69 = vector.load %arg2[%c0_25, %c0_26] : memref<16x128xf32, #tpu.memory_space<vmem>>, vector<4x128xf32>
    %cst_27 = arith.constant dense<0.000000e+00> : vector<128xf32>
    %70 = vector.multi_reduction <add>, %68, %cst_27 [0] : vector<4x128xf32> to vector<128xf32>
    %71 = vector.shape_cast %70 : vector<128xf32> to vector<1x128xf32>
    %cst_28 = arith.constant 2.500000e-01 : f32
    %72 = vector.broadcast %cst_28 : f32 to vector<1x128xf32>
    %73 = arith.mulf %71, %72 : vector<1x128xf32>
    %cst_29 = arith.constant dense<0.000000e+00> : vector<128xf32>
    %74 = vector.multi_reduction <add>, %69, %cst_29 [0] : vector<4x128xf32> to vector<128xf32>
    %75 = vector.shape_cast %74 : vector<128xf32> to vector<1x128xf32>
    %cst_30 = arith.constant 2.500000e-01 : f32
    %76 = vector.broadcast %cst_30 : f32 to vector<1x128xf32>
    %77 = arith.mulf %75, %76 : vector<1x128xf32>
    %78 = vector.broadcast %73 : vector<1x128xf32> to vector<4x128xf32>
    %79 = arith.subf %68, %78 : vector<4x128xf32>
    %80 = vector.broadcast %77 : vector<1x128xf32> to vector<4x128xf32>
    %81 = arith.subf %69, %80 : vector<4x128xf32>
    %82 = arith.mulf %79, %79 : vector<4x128xf32>
    %cst_31 = arith.constant dense<0.000000e+00> : vector<128xf32>
    %83 = vector.multi_reduction <add>, %82, %cst_31 [0] : vector<4x128xf32> to vector<128xf32>
    %84 = vector.shape_cast %83 : vector<128xf32> to vector<1x128xf32>
    %cst_32 = arith.constant 2.500000e-01 : f32
    %85 = vector.broadcast %cst_32 : f32 to vector<1x128xf32>
    %86 = arith.mulf %84, %85 : vector<1x128xf32>
    %87 = arith.mulf %81, %81 : vector<4x128xf32>
    %cst_33 = arith.constant dense<0.000000e+00> : vector<128xf32>
    %88 = vector.multi_reduction <add>, %87, %cst_33 [0] : vector<4x128xf32> to vector<128xf32>
    %89 = vector.shape_cast %88 : vector<128xf32> to vector<1x128xf32>
    %cst_34 = arith.constant 2.500000e-01 : f32
    %90 = vector.broadcast %cst_34 : f32 to vector<1x128xf32>
    %91 = arith.mulf %89, %90 : vector<1x128xf32>
    %92 = arith.mulf %79, %81 : vector<4x128xf32>
    %cst_35 = arith.constant dense<0.000000e+00> : vector<128xf32>
    %93 = vector.multi_reduction <add>, %92, %cst_35 [0] : vector<4x128xf32> to vector<128xf32>
    %94 = vector.shape_cast %93 : vector<128xf32> to vector<1x128xf32>
    %cst_36 = arith.constant 2.500000e-01 : f32
    %95 = vector.broadcast %cst_36 : f32 to vector<1x128xf32>
    %96 = arith.mulf %94, %95 : vector<1x128xf32>
    %97 = arith.mulf %86, %91 : vector<1x128xf32>
    %98 = math.sqrt %97 : vector<1x128xf32>
    %cst_37 = arith.constant 9.99999974E-6 : f32
    %99 = vector.broadcast %cst_37 : f32 to vector<1x128xf32>
    %100 = arith.addf %96, %99 : vector<1x128xf32>
    %cst_38 = arith.constant 9.99999974E-6 : f32
    %101 = vector.broadcast %cst_38 : f32 to vector<1x128xf32>
    %102 = arith.addf %98, %101 : vector<1x128xf32>
    %103 = tpu.reciprocal %102 {approx = true} : vector<1x128xf32> -> vector<1x128xf32>
    %104 = arith.mulf %100, %103 : vector<1x128xf32>
    %cst_39 = arith.constant 1.000000e+00 : f32
    %105 = vector.broadcast %cst_39 : f32 to vector<1x128xf32>
    %106 = arith.subf %105, %104 : vector<1x128xf32>
    %107 = arith.addf %65, %106 : vector<1x128xf32>
    %cst_40 = arith.constant dense<0xFF800000> : vector<128xf32>
    %108 = vector.multi_reduction <maximumf>, %68, %cst_40 [0] : vector<4x128xf32> to vector<128xf32>
    %109 = vector.shape_cast %108 : vector<128xf32> to vector<1x128xf32>
    %110 = vector.broadcast %109 : vector<1x128xf32> to vector<4x128xf32>
    %111 = arith.subf %68, %110 : vector<4x128xf32>
    %cst_41 = arith.constant dense<0xFF800000> : vector<128xf32>
    %112 = vector.multi_reduction <maximumf>, %69, %cst_41 [0] : vector<4x128xf32> to vector<128xf32>
    %113 = vector.shape_cast %112 : vector<128xf32> to vector<1x128xf32>
    %114 = vector.broadcast %113 : vector<1x128xf32> to vector<4x128xf32>
    %115 = arith.subf %69, %114 : vector<4x128xf32>
    %116 = math.exp %111 : vector<4x128xf32>
    %cst_42 = arith.constant dense<0.000000e+00> : vector<128xf32>
    %117 = vector.multi_reduction <add>, %116, %cst_42 [0] : vector<4x128xf32> to vector<128xf32>
    %118 = vector.shape_cast %117 : vector<128xf32> to vector<1x128xf32>
    %119 = math.log %118 : vector<1x128xf32>
    %120 = math.exp %115 : vector<4x128xf32>
    %cst_43 = arith.constant dense<0.000000e+00> : vector<128xf32>
    %121 = vector.multi_reduction <add>, %120, %cst_43 [0] : vector<4x128xf32> to vector<128xf32>
    %122 = vector.shape_cast %121 : vector<128xf32> to vector<1x128xf32>
    %123 = math.log %122 : vector<1x128xf32>
    %124 = vector.broadcast %119 : vector<1x128xf32> to vector<4x128xf32>
    %125 = arith.subf %111, %124 : vector<4x128xf32>
    %126 = vector.broadcast %123 : vector<1x128xf32> to vector<4x128xf32>
    %127 = arith.subf %115, %126 : vector<4x128xf32>
    %128 = math.exp %125 : vector<4x128xf32>
    %129 = arith.subf %125, %127 : vector<4x128xf32>
    %130 = arith.mulf %128, %129 : vector<4x128xf32>
    %cst_44 = arith.constant dense<0.000000e+00> : vector<128xf32>
    %131 = vector.multi_reduction <add>, %130, %cst_44 [0] : vector<4x128xf32> to vector<128xf32>
    %132 = vector.shape_cast %131 : vector<128xf32> to vector<1x128xf32>
    %133 = arith.addf %66, %132 : vector<1x128xf32>
    %134 = arith.subf %73, %77 : vector<1x128xf32>
    %135 = math.absf %134 : vector<1x128xf32>
    %136 = arith.addf %67, %135 : vector<1x128xf32>
    %c2 = arith.constant 2 : index
    %c0_45 = arith.constant 0 : index
    %137 = vector.load %arg1[%c2, %c0_45] : memref<16x128xf32, #tpu.memory_space<vmem>>, vector<4x128xf32>
    %c2_46 = arith.constant 2 : index
    %c0_47 = arith.constant 0 : index
    %138 = vector.load %arg2[%c2_46, %c0_47] : memref<16x128xf32, #tpu.memory_space<vmem>>, vector<4x128xf32>
    %cst_48 = arith.constant dense<0.000000e+00> : vector<128xf32>
    %139 = vector.multi_reduction <add>, %137, %cst_48 [0] : vector<4x128xf32> to vector<128xf32>
    %140 = vector.shape_cast %139 : vector<128xf32> to vector<1x128xf32>
    %cst_49 = arith.constant 2.500000e-01 : f32
    %141 = vector.broadcast %cst_49 : f32 to vector<1x128xf32>
    %142 = arith.mulf %140, %141 : vector<1x128xf32>
    %cst_50 = arith.constant dense<0.000000e+00> : vector<128xf32>
    %143 = vector.multi_reduction <add>, %138, %cst_50 [0] : vector<4x128xf32> to vector<128xf32>
    %144 = vector.shape_cast %143 : vector<128xf32> to vector<1x128xf32>
    %cst_51 = arith.constant 2.500000e-01 : f32
    %145 = vector.broadcast %cst_51 : f32 to vector<1x128xf32>
    %146 = arith.mulf %144, %145 : vector<1x128xf32>
    %147 = vector.broadcast %142 : vector<1x128xf32> to vector<4x128xf32>
    %148 = arith.subf %137, %147 : vector<4x128xf32>
    %149 = vector.broadcast %146 : vector<1x128xf32> to vector<4x128xf32>
    %150 = arith.subf %138, %149 : vector<4x128xf32>
    %151 = arith.mulf %148, %148 : vector<4x128xf32>
    %cst_52 = arith.constant dense<0.000000e+00> : vector<128xf32>
    %152 = vector.multi_reduction <add>, %151, %cst_52 [0] : vector<4x128xf32> to vector<128xf32>
    %153 = vector.shape_cast %152 : vector<128xf32> to vector<1x128xf32>
    %cst_53 = arith.constant 2.500000e-01 : f32
    %154 = vector.broadcast %cst_53 : f32 to vector<1x128xf32>
    %155 = arith.mulf %153, %154 : vector<1x128xf32>
    %156 = arith.mulf %150, %150 : vector<4x128xf32>
    %cst_54 = arith.constant dense<0.000000e+00> : vector<128xf32>
    %157 = vector.multi_reduction <add>, %156, %cst_54 [0] : vector<4x128xf32> to vector<128xf32>
    %158 = vector.shape_cast %157 : vector<128xf32> to vector<1x128xf32>
    %cst_55 = arith.constant 2.500000e-01 : f32
    %159 = vector.broadcast %cst_55 : f32 to vector<1x128xf32>
    %160 = arith.mulf %158, %159 : vector<1x128xf32>
    %161 = arith.mulf %148, %150 : vector<4x128xf32>
    %cst_56 = arith.constant dense<0.000000e+00> : vector<128xf32>
    %162 = vector.multi_reduction <add>, %161, %cst_56 [0] : vector<4x128xf32> to vector<128xf32>
    %163 = vector.shape_cast %162 : vector<128xf32> to vector<1x128xf32>
    %cst_57 = arith.constant 2.500000e-01 : f32
    %164 = vector.broadcast %cst_57 : f32 to vector<1x128xf32>
    %165 = arith.mulf %163, %164 : vector<1x128xf32>
    %166 = arith.mulf %155, %160 : vector<1x128xf32>
    %167 = math.sqrt %166 : vector<1x128xf32>
    %cst_58 = arith.constant 9.99999974E-6 : f32
    %168 = vector.broadcast %cst_58 : f32 to vector<1x128xf32>
    %169 = arith.addf %165, %168 : vector<1x128xf32>
    %cst_59 = arith.constant 9.99999974E-6 : f32
    %170 = vector.broadcast %cst_59 : f32 to vector<1x128xf32>
    %171 = arith.addf %167, %170 : vector<1x128xf32>
    %172 = tpu.reciprocal %171 {approx = true} : vector<1x128xf32> -> vector<1x128xf32>
    %173 = arith.mulf %169, %172 : vector<1x128xf32>
    %cst_60 = arith.constant 1.000000e+00 : f32
    %174 = vector.broadcast %cst_60 : f32 to vector<1x128xf32>
    %175 = arith.subf %174, %173 : vector<1x128xf32>
    %176 = arith.addf %107, %175 : vector<1x128xf32>
    %cst_61 = arith.constant dense<0xFF800000> : vector<128xf32>
    %177 = vector.multi_reduction <maximumf>, %137, %cst_61 [0] : vector<4x128xf32> to vector<128xf32>
    %178 = vector.shape_cast %177 : vector<128xf32> to vector<1x128xf32>
    %179 = vector.broadcast %178 : vector<1x128xf32> to vector<4x128xf32>
    %180 = arith.subf %137, %179 : vector<4x128xf32>
    %cst_62 = arith.constant dense<0xFF800000> : vector<128xf32>
    %181 = vector.multi_reduction <maximumf>, %138, %cst_62 [0] : vector<4x128xf32> to vector<128xf32>
    %182 = vector.shape_cast %181 : vector<128xf32> to vector<1x128xf32>
    %183 = vector.broadcast %182 : vector<1x128xf32> to vector<4x128xf32>
    %184 = arith.subf %138, %183 : vector<4x128xf32>
    %185 = math.exp %180 : vector<4x128xf32>
    %cst_63 = arith.constant dense<0.000000e+00> : vector<128xf32>
    %186 = vector.multi_reduction <add>, %185, %cst_63 [0] : vector<4x128xf32> to vector<128xf32>
    %187 = vector.shape_cast %186 : vector<128xf32> to vector<1x128xf32>
    %188 = math.log %187 : vector<1x128xf32>
    %189 = math.exp %184 : vector<4x128xf32>
    %cst_64 = arith.constant dense<0.000000e+00> : vector<128xf32>
    %190 = vector.multi_reduction <add>, %189, %cst_64 [0] : vector<4x128xf32> to vector<128xf32>
    %191 = vector.shape_cast %190 : vector<128xf32> to vector<1x128xf32>
    %192 = math.log %191 : vector<1x128xf32>
    %193 = vector.broadcast %188 : vector<1x128xf32> to vector<4x128xf32>
    %194 = arith.subf %180, %193 : vector<4x128xf32>
    %195 = vector.broadcast %192 : vector<1x128xf32> to vector<4x128xf32>
    %196 = arith.subf %184, %195 : vector<4x128xf32>
    %197 = math.exp %194 : vector<4x128xf32>
    %198 = arith.subf %194, %196 : vector<4x128xf32>
    %199 = arith.mulf %197, %198 : vector<4x128xf32>
    %cst_65 = arith.constant dense<0.000000e+00> : vector<128xf32>
    %200 = vector.multi_reduction <add>, %199, %cst_65 [0] : vector<4x128xf32> to vector<128xf32>
    %201 = vector.shape_cast %200 : vector<128xf32> to vector<1x128xf32>
    %202 = arith.addf %133, %201 : vector<1x128xf32>
    %203 = arith.subf %142, %146 : vector<1x128xf32>
    %204 = math.absf %203 : vector<1x128xf32>
    %205 = arith.addf %136, %204 : vector<1x128xf32>
    %c4 = arith.constant 4 : index
    %c0_66 = arith.constant 0 : index
    %206 = vector.load %arg1[%c4, %c0_66] : memref<16x128xf32, #tpu.memory_space<vmem>>, vector<4x128xf32>
    %c4_67 = arith.constant 4 : index
    %c0_68 = arith.constant 0 : index
    %207 = vector.load %arg2[%c4_67, %c0_68] : memref<16x128xf32, #tpu.memory_space<vmem>>, vector<4x128xf32>
    %cst_69 = arith.constant dense<0.000000e+00> : vector<128xf32>
    %208 = vector.multi_reduction <add>, %206, %cst_69 [0] : vector<4x128xf32> to vector<128xf32>
    %209 = vector.shape_cast %208 : vector<128xf32> to vector<1x128xf32>
    %cst_70 = arith.constant 2.500000e-01 : f32
    %210 = vector.broadcast %cst_70 : f32 to vector<1x128xf32>
    %211 = arith.mulf %209, %210 : vector<1x128xf32>
    %cst_71 = arith.constant dense<0.000000e+00> : vector<128xf32>
    %212 = vector.multi_reduction <add>, %207, %cst_71 [0] : vector<4x128xf32> to vector<128xf32>
    %213 = vector.shape_cast %212 : vector<128xf32> to vector<1x128xf32>
    %cst_72 = arith.constant 2.500000e-01 : f32
    %214 = vector.broadcast %cst_72 : f32 to vector<1x128xf32>
    %215 = arith.mulf %213, %214 : vector<1x128xf32>
    %216 = vector.broadcast %211 : vector<1x128xf32> to vector<4x128xf32>
    %217 = arith.subf %206, %216 : vector<4x128xf32>
    %218 = vector.broadcast %215 : vector<1x128xf32> to vector<4x128xf32>
    %219 = arith.subf %207, %218 : vector<4x128xf32>
    %220 = arith.mulf %217, %217 : vector<4x128xf32>
    %cst_73 = arith.constant dense<0.000000e+00> : vector<128xf32>
    %221 = vector.multi_reduction <add>, %220, %cst_73 [0] : vector<4x128xf32> to vector<128xf32>
    %222 = vector.shape_cast %221 : vector<128xf32> to vector<1x128xf32>
    %cst_74 = arith.constant 2.500000e-01 : f32
    %223 = vector.broadcast %cst_74 : f32 to vector<1x128xf32>
    %224 = arith.mulf %222, %223 : vector<1x128xf32>
    %225 = arith.mulf %219, %219 : vector<4x128xf32>
    %cst_75 = arith.constant dense<0.000000e+00> : vector<128xf32>
    %226 = vector.multi_reduction <add>, %225, %cst_75 [0] : vector<4x128xf32> to vector<128xf32>
    %227 = vector.shape_cast %226 : vector<128xf32> to vector<1x128xf32>
    %cst_76 = arith.constant 2.500000e-01 : f32
    %228 = vector.broadcast %cst_76 : f32 to vector<1x128xf32>
    %229 = arith.mulf %227, %228 : vector<1x128xf32>
    %230 = arith.mulf %217, %219 : vector<4x128xf32>
    %cst_77 = arith.constant dense<0.000000e+00> : vector<128xf32>
    %231 = vector.multi_reduction <add>, %230, %cst_77 [0] : vector<4x128xf32> to vector<128xf32>
    %232 = vector.shape_cast %231 : vector<128xf32> to vector<1x128xf32>
    %cst_78 = arith.constant 2.500000e-01 : f32
    %233 = vector.broadcast %cst_78 : f32 to vector<1x128xf32>
    %234 = arith.mulf %232, %233 : vector<1x128xf32>
    %235 = arith.mulf %224, %229 : vector<1x128xf32>
    %236 = math.sqrt %235 : vector<1x128xf32>
    %cst_79 = arith.constant 9.99999974E-6 : f32
    %237 = vector.broadcast %cst_79 : f32 to vector<1x128xf32>
    %238 = arith.addf %234, %237 : vector<1x128xf32>
    %cst_80 = arith.constant 9.99999974E-6 : f32
    %239 = vector.broadcast %cst_80 : f32 to vector<1x128xf32>
    %240 = arith.addf %236, %239 : vector<1x128xf32>
    %241 = tpu.reciprocal %240 {approx = true} : vector<1x128xf32> -> vector<1x128xf32>
    %242 = arith.mulf %238, %241 : vector<1x128xf32>
    %cst_81 = arith.constant 1.000000e+00 : f32
    %243 = vector.broadcast %cst_81 : f32 to vector<1x128xf32>
    %244 = arith.subf %243, %242 : vector<1x128xf32>
    %245 = arith.addf %176, %244 : vector<1x128xf32>
    %cst_82 = arith.constant dense<0xFF800000> : vector<128xf32>
    %246 = vector.multi_reduction <maximumf>, %206, %cst_82 [0] : vector<4x128xf32> to vector<128xf32>
    %247 = vector.shape_cast %246 : vector<128xf32> to vector<1x128xf32>
    %248 = vector.broadcast %247 : vector<1x128xf32> to vector<4x128xf32>
    %249 = arith.subf %206, %248 : vector<4x128xf32>
    %cst_83 = arith.constant dense<0xFF800000> : vector<128xf32>
    %250 = vector.multi_reduction <maximumf>, %207, %cst_83 [0] : vector<4x128xf32> to vector<128xf32>
    %251 = vector.shape_cast %250 : vector<128xf32> to vector<1x128xf32>
    %252 = vector.broadcast %251 : vector<1x128xf32> to vector<4x128xf32>
    %253 = arith.subf %207, %252 : vector<4x128xf32>
    %254 = math.exp %249 : vector<4x128xf32>
    %cst_84 = arith.constant dense<0.000000e+00> : vector<128xf32>
    %255 = vector.multi_reduction <add>, %254, %cst_84 [0] : vector<4x128xf32> to vector<128xf32>
    %256 = vector.shape_cast %255 : vector<128xf32> to vector<1x128xf32>
    %257 = math.log %256 : vector<1x128xf32>
    %258 = math.exp %253 : vector<4x128xf32>
    %cst_85 = arith.constant dense<0.000000e+00> : vector<128xf32>
    %259 = vector.multi_reduction <add>, %258, %cst_85 [0] : vector<4x128xf32> to vector<128xf32>
    %260 = vector.shape_cast %259 : vector<128xf32> to vector<1x128xf32>
    %261 = math.log %260 : vector<1x128xf32>
    %262 = vector.broadcast %257 : vector<1x128xf32> to vector<4x128xf32>
    %263 = arith.subf %249, %262 : vector<4x128xf32>
    %264 = vector.broadcast %261 : vector<1x128xf32> to vector<4x128xf32>
    %265 = arith.subf %253, %264 : vector<4x128xf32>
    %266 = math.exp %263 : vector<4x128xf32>
    %267 = arith.subf %263, %265 : vector<4x128xf32>
    %268 = arith.mulf %266, %267 : vector<4x128xf32>
    %cst_86 = arith.constant dense<0.000000e+00> : vector<128xf32>
    %269 = vector.multi_reduction <add>, %268, %cst_86 [0] : vector<4x128xf32> to vector<128xf32>
    %270 = vector.shape_cast %269 : vector<128xf32> to vector<1x128xf32>
    %271 = arith.addf %202, %270 : vector<1x128xf32>
    %272 = arith.subf %211, %215 : vector<1x128xf32>
    %273 = math.absf %272 : vector<1x128xf32>
    %274 = arith.addf %205, %273 : vector<1x128xf32>
    %c6 = arith.constant 6 : index
    %c0_87 = arith.constant 0 : index
    %275 = vector.load %arg1[%c6, %c0_87] : memref<16x128xf32, #tpu.memory_space<vmem>>, vector<4x128xf32>
    %c6_88 = arith.constant 6 : index
    %c0_89 = arith.constant 0 : index
    %276 = vector.load %arg2[%c6_88, %c0_89] : memref<16x128xf32, #tpu.memory_space<vmem>>, vector<4x128xf32>
    %cst_90 = arith.constant dense<0.000000e+00> : vector<128xf32>
    %277 = vector.multi_reduction <add>, %275, %cst_90 [0] : vector<4x128xf32> to vector<128xf32>
    %278 = vector.shape_cast %277 : vector<128xf32> to vector<1x128xf32>
    %cst_91 = arith.constant 2.500000e-01 : f32
    %279 = vector.broadcast %cst_91 : f32 to vector<1x128xf32>
    %280 = arith.mulf %278, %279 : vector<1x128xf32>
    %cst_92 = arith.constant dense<0.000000e+00> : vector<128xf32>
    %281 = vector.multi_reduction <add>, %276, %cst_92 [0] : vector<4x128xf32> to vector<128xf32>
    %282 = vector.shape_cast %281 : vector<128xf32> to vector<1x128xf32>
    %cst_93 = arith.constant 2.500000e-01 : f32
    %283 = vector.broadcast %cst_93 : f32 to vector<1x128xf32>
    %284 = arith.mulf %282, %283 : vector<1x128xf32>
    %285 = vector.broadcast %280 : vector<1x128xf32> to vector<4x128xf32>
    %286 = arith.subf %275, %285 : vector<4x128xf32>
    %287 = vector.broadcast %284 : vector<1x128xf32> to vector<4x128xf32>
    %288 = arith.subf %276, %287 : vector<4x128xf32>
    %289 = arith.mulf %286, %286 : vector<4x128xf32>
    %cst_94 = arith.constant dense<0.000000e+00> : vector<128xf32>
    %290 = vector.multi_reduction <add>, %289, %cst_94 [0] : vector<4x128xf32> to vector<128xf32>
    %291 = vector.shape_cast %290 : vector<128xf32> to vector<1x128xf32>
    %cst_95 = arith.constant 2.500000e-01 : f32
    %292 = vector.broadcast %cst_95 : f32 to vector<1x128xf32>
    %293 = arith.mulf %291, %292 : vector<1x128xf32>
    %294 = arith.mulf %288, %288 : vector<4x128xf32>
    %cst_96 = arith.constant dense<0.000000e+00> : vector<128xf32>
    %295 = vector.multi_reduction <add>, %294, %cst_96 [0] : vector<4x128xf32> to vector<128xf32>
    %296 = vector.shape_cast %295 : vector<128xf32> to vector<1x128xf32>
    %cst_97 = arith.constant 2.500000e-01 : f32
    %297 = vector.broadcast %cst_97 : f32 to vector<1x128xf32>
    %298 = arith.mulf %296, %297 : vector<1x128xf32>
    %299 = arith.mulf %286, %288 : vector<4x128xf32>
    %cst_98 = arith.constant dense<0.000000e+00> : vector<128xf32>
    %300 = vector.multi_reduction <add>, %299, %cst_98 [0] : vector<4x128xf32> to vector<128xf32>
    %301 = vector.shape_cast %300 : vector<128xf32> to vector<1x128xf32>
    %cst_99 = arith.constant 2.500000e-01 : f32
    %302 = vector.broadcast %cst_99 : f32 to vector<1x128xf32>
    %303 = arith.mulf %301, %302 : vector<1x128xf32>
    %304 = arith.mulf %293, %298 : vector<1x128xf32>
    %305 = math.sqrt %304 : vector<1x128xf32>
    %cst_100 = arith.constant 9.99999974E-6 : f32
    %306 = vector.broadcast %cst_100 : f32 to vector<1x128xf32>
    %307 = arith.addf %303, %306 : vector<1x128xf32>
    %cst_101 = arith.constant 9.99999974E-6 : f32
    %308 = vector.broadcast %cst_101 : f32 to vector<1x128xf32>
    %309 = arith.addf %305, %308 : vector<1x128xf32>
    %310 = tpu.reciprocal %309 {approx = true} : vector<1x128xf32> -> vector<1x128xf32>
    %311 = arith.mulf %307, %310 : vector<1x128xf32>
    %cst_102 = arith.constant 1.000000e+00 : f32
    %312 = vector.broadcast %cst_102 : f32 to vector<1x128xf32>
    %313 = arith.subf %312, %311 : vector<1x128xf32>
    %314 = arith.addf %245, %313 : vector<1x128xf32>
    %cst_103 = arith.constant dense<0xFF800000> : vector<128xf32>
    %315 = vector.multi_reduction <maximumf>, %275, %cst_103 [0] : vector<4x128xf32> to vector<128xf32>
    %316 = vector.shape_cast %315 : vector<128xf32> to vector<1x128xf32>
    %317 = vector.broadcast %316 : vector<1x128xf32> to vector<4x128xf32>
    %318 = arith.subf %275, %317 : vector<4x128xf32>
    %cst_104 = arith.constant dense<0xFF800000> : vector<128xf32>
    %319 = vector.multi_reduction <maximumf>, %276, %cst_104 [0] : vector<4x128xf32> to vector<128xf32>
    %320 = vector.shape_cast %319 : vector<128xf32> to vector<1x128xf32>
    %321 = vector.broadcast %320 : vector<1x128xf32> to vector<4x128xf32>
    %322 = arith.subf %276, %321 : vector<4x128xf32>
    %323 = math.exp %318 : vector<4x128xf32>
    %cst_105 = arith.constant dense<0.000000e+00> : vector<128xf32>
    %324 = vector.multi_reduction <add>, %323, %cst_105 [0] : vector<4x128xf32> to vector<128xf32>
    %325 = vector.shape_cast %324 : vector<128xf32> to vector<1x128xf32>
    %326 = math.log %325 : vector<1x128xf32>
    %327 = math.exp %322 : vector<4x128xf32>
    %cst_106 = arith.constant dense<0.000000e+00> : vector<128xf32>
    %328 = vector.multi_reduction <add>, %327, %cst_106 [0] : vector<4x128xf32> to vector<128xf32>
    %329 = vector.shape_cast %328 : vector<128xf32> to vector<1x128xf32>
    %330 = math.log %329 : vector<1x128xf32>
    %331 = vector.broadcast %326 : vector<1x128xf32> to vector<4x128xf32>
    %332 = arith.subf %318, %331 : vector<4x128xf32>
    %333 = vector.broadcast %330 : vector<1x128xf32> to vector<4x128xf32>
    %334 = arith.subf %322, %333 : vector<4x128xf32>
    %335 = math.exp %332 : vector<4x128xf32>
    %336 = arith.subf %332, %334 : vector<4x128xf32>
    %337 = arith.mulf %335, %336 : vector<4x128xf32>
    %cst_107 = arith.constant dense<0.000000e+00> : vector<128xf32>
    %338 = vector.multi_reduction <add>, %337, %cst_107 [0] : vector<4x128xf32> to vector<128xf32>
    %339 = vector.shape_cast %338 : vector<128xf32> to vector<1x128xf32>
    %340 = arith.addf %271, %339 : vector<1x128xf32>
    %341 = arith.subf %280, %284 : vector<1x128xf32>
    %342 = math.absf %341 : vector<1x128xf32>
    %343 = arith.addf %274, %342 : vector<1x128xf32>
    %c8 = arith.constant 8 : index
    %c0_108 = arith.constant 0 : index
    %344 = vector.load %arg1[%c8, %c0_108] : memref<16x128xf32, #tpu.memory_space<vmem>>, vector<4x128xf32>
    %c8_109 = arith.constant 8 : index
    %c0_110 = arith.constant 0 : index
    %345 = vector.load %arg2[%c8_109, %c0_110] : memref<16x128xf32, #tpu.memory_space<vmem>>, vector<4x128xf32>
    %cst_111 = arith.constant dense<0.000000e+00> : vector<128xf32>
    %346 = vector.multi_reduction <add>, %344, %cst_111 [0] : vector<4x128xf32> to vector<128xf32>
    %347 = vector.shape_cast %346 : vector<128xf32> to vector<1x128xf32>
    %cst_112 = arith.constant 2.500000e-01 : f32
    %348 = vector.broadcast %cst_112 : f32 to vector<1x128xf32>
    %349 = arith.mulf %347, %348 : vector<1x128xf32>
    %cst_113 = arith.constant dense<0.000000e+00> : vector<128xf32>
    %350 = vector.multi_reduction <add>, %345, %cst_113 [0] : vector<4x128xf32> to vector<128xf32>
    %351 = vector.shape_cast %350 : vector<128xf32> to vector<1x128xf32>
    %cst_114 = arith.constant 2.500000e-01 : f32
    %352 = vector.broadcast %cst_114 : f32 to vector<1x128xf32>
    %353 = arith.mulf %351, %352 : vector<1x128xf32>
    %354 = vector.broadcast %349 : vector<1x128xf32> to vector<4x128xf32>
    %355 = arith.subf %344, %354 : vector<4x128xf32>
    %356 = vector.broadcast %353 : vector<1x128xf32> to vector<4x128xf32>
    %357 = arith.subf %345, %356 : vector<4x128xf32>
    %358 = arith.mulf %355, %355 : vector<4x128xf32>
    %cst_115 = arith.constant dense<0.000000e+00> : vector<128xf32>
    %359 = vector.multi_reduction <add>, %358, %cst_115 [0] : vector<4x128xf32> to vector<128xf32>
    %360 = vector.shape_cast %359 : vector<128xf32> to vector<1x128xf32>
    %cst_116 = arith.constant 2.500000e-01 : f32
    %361 = vector.broadcast %cst_116 : f32 to vector<1x128xf32>
    %362 = arith.mulf %360, %361 : vector<1x128xf32>
    %363 = arith.mulf %357, %357 : vector<4x128xf32>
    %cst_117 = arith.constant dense<0.000000e+00> : vector<128xf32>
    %364 = vector.multi_reduction <add>, %363, %cst_117 [0] : vector<4x128xf32> to vector<128xf32>
    %365 = vector.shape_cast %364 : vector<128xf32> to vector<1x128xf32>
    %cst_118 = arith.constant 2.500000e-01 : f32
    %366 = vector.broadcast %cst_118 : f32 to vector<1x128xf32>
    %367 = arith.mulf %365, %366 : vector<1x128xf32>
    %368 = arith.mulf %355, %357 : vector<4x128xf32>
    %cst_119 = arith.constant dense<0.000000e+00> : vector<128xf32>
    %369 = vector.multi_reduction <add>, %368, %cst_119 [0] : vector<4x128xf32> to vector<128xf32>
    %370 = vector.shape_cast %369 : vector<128xf32> to vector<1x128xf32>
    %cst_120 = arith.constant 2.500000e-01 : f32
    %371 = vector.broadcast %cst_120 : f32 to vector<1x128xf32>
    %372 = arith.mulf %370, %371 : vector<1x128xf32>
    %373 = arith.mulf %362, %367 : vector<1x128xf32>
    %374 = math.sqrt %373 : vector<1x128xf32>
    %cst_121 = arith.constant 9.99999974E-6 : f32
    %375 = vector.broadcast %cst_121 : f32 to vector<1x128xf32>
    %376 = arith.addf %372, %375 : vector<1x128xf32>
    %cst_122 = arith.constant 9.99999974E-6 : f32
    %377 = vector.broadcast %cst_122 : f32 to vector<1x128xf32>
    %378 = arith.addf %374, %377 : vector<1x128xf32>
    %379 = tpu.reciprocal %378 {approx = true} : vector<1x128xf32> -> vector<1x128xf32>
    %380 = arith.mulf %376, %379 : vector<1x128xf32>
    %cst_123 = arith.constant 1.000000e+00 : f32
    %381 = vector.broadcast %cst_123 : f32 to vector<1x128xf32>
    %382 = arith.subf %381, %380 : vector<1x128xf32>
    %383 = arith.addf %314, %382 : vector<1x128xf32>
    %cst_124 = arith.constant dense<0xFF800000> : vector<128xf32>
    %384 = vector.multi_reduction <maximumf>, %344, %cst_124 [0] : vector<4x128xf32> to vector<128xf32>
    %385 = vector.shape_cast %384 : vector<128xf32> to vector<1x128xf32>
    %386 = vector.broadcast %385 : vector<1x128xf32> to vector<4x128xf32>
    %387 = arith.subf %344, %386 : vector<4x128xf32>
    %cst_125 = arith.constant dense<0xFF800000> : vector<128xf32>
    %388 = vector.multi_reduction <maximumf>, %345, %cst_125 [0] : vector<4x128xf32> to vector<128xf32>
    %389 = vector.shape_cast %388 : vector<128xf32> to vector<1x128xf32>
    %390 = vector.broadcast %389 : vector<1x128xf32> to vector<4x128xf32>
    %391 = arith.subf %345, %390 : vector<4x128xf32>
    %392 = math.exp %387 : vector<4x128xf32>
    %cst_126 = arith.constant dense<0.000000e+00> : vector<128xf32>
    %393 = vector.multi_reduction <add>, %392, %cst_126 [0] : vector<4x128xf32> to vector<128xf32>
    %394 = vector.shape_cast %393 : vector<128xf32> to vector<1x128xf32>
    %395 = math.log %394 : vector<1x128xf32>
    %396 = math.exp %391 : vector<4x128xf32>
    %cst_127 = arith.constant dense<0.000000e+00> : vector<128xf32>
    %397 = vector.multi_reduction <add>, %396, %cst_127 [0] : vector<4x128xf32> to vector<128xf32>
    %398 = vector.shape_cast %397 : vector<128xf32> to vector<1x128xf32>
    %399 = math.log %398 : vector<1x128xf32>
    %400 = vector.broadcast %395 : vector<1x128xf32> to vector<4x128xf32>
    %401 = arith.subf %387, %400 : vector<4x128xf32>
    %402 = vector.broadcast %399 : vector<1x128xf32> to vector<4x128xf32>
    %403 = arith.subf %391, %402 : vector<4x128xf32>
    %404 = math.exp %401 : vector<4x128xf32>
    %405 = arith.subf %401, %403 : vector<4x128xf32>
    %406 = arith.mulf %404, %405 : vector<4x128xf32>
    %cst_128 = arith.constant dense<0.000000e+00> : vector<128xf32>
    %407 = vector.multi_reduction <add>, %406, %cst_128 [0] : vector<4x128xf32> to vector<128xf32>
    %408 = vector.shape_cast %407 : vector<128xf32> to vector<1x128xf32>
    %409 = arith.addf %340, %408 : vector<1x128xf32>
    %410 = arith.subf %349, %353 : vector<1x128xf32>
    %411 = math.absf %410 : vector<1x128xf32>
    %412 = arith.addf %343, %411 : vector<1x128xf32>
    %c10 = arith.constant 10 : index
    %c0_129 = arith.constant 0 : index
    %413 = vector.load %arg1[%c10, %c0_129] : memref<16x128xf32, #tpu.memory_space<vmem>>, vector<4x128xf32>
    %c10_130 = arith.constant 10 : index
    %c0_131 = arith.constant 0 : index
    %414 = vector.load %arg2[%c10_130, %c0_131] : memref<16x128xf32, #tpu.memory_space<vmem>>, vector<4x128xf32>
    %cst_132 = arith.constant dense<0.000000e+00> : vector<128xf32>
    %415 = vector.multi_reduction <add>, %413, %cst_132 [0] : vector<4x128xf32> to vector<128xf32>
    %416 = vector.shape_cast %415 : vector<128xf32> to vector<1x128xf32>
    %cst_133 = arith.constant 2.500000e-01 : f32
    %417 = vector.broadcast %cst_133 : f32 to vector<1x128xf32>
    %418 = arith.mulf %416, %417 : vector<1x128xf32>
    %cst_134 = arith.constant dense<0.000000e+00> : vector<128xf32>
    %419 = vector.multi_reduction <add>, %414, %cst_134 [0] : vector<4x128xf32> to vector<128xf32>
    %420 = vector.shape_cast %419 : vector<128xf32> to vector<1x128xf32>
    %cst_135 = arith.constant 2.500000e-01 : f32
    %421 = vector.broadcast %cst_135 : f32 to vector<1x128xf32>
    %422 = arith.mulf %420, %421 : vector<1x128xf32>
    %423 = vector.broadcast %418 : vector<1x128xf32> to vector<4x128xf32>
    %424 = arith.subf %413, %423 : vector<4x128xf32>
    %425 = vector.broadcast %422 : vector<1x128xf32> to vector<4x128xf32>
    %426 = arith.subf %414, %425 : vector<4x128xf32>
    %427 = arith.mulf %424, %424 : vector<4x128xf32>
    %cst_136 = arith.constant dense<0.000000e+00> : vector<128xf32>
    %428 = vector.multi_reduction <add>, %427, %cst_136 [0] : vector<4x128xf32> to vector<128xf32>
    %429 = vector.shape_cast %428 : vector<128xf32> to vector<1x128xf32>
    %cst_137 = arith.constant 2.500000e-01 : f32
    %430 = vector.broadcast %cst_137 : f32 to vector<1x128xf32>
    %431 = arith.mulf %429, %430 : vector<1x128xf32>
    %432 = arith.mulf %426, %426 : vector<4x128xf32>
    %cst_138 = arith.constant dense<0.000000e+00> : vector<128xf32>
    %433 = vector.multi_reduction <add>, %432, %cst_138 [0] : vector<4x128xf32> to vector<128xf32>
    %434 = vector.shape_cast %433 : vector<128xf32> to vector<1x128xf32>
    %cst_139 = arith.constant 2.500000e-01 : f32
    %435 = vector.broadcast %cst_139 : f32 to vector<1x128xf32>
    %436 = arith.mulf %434, %435 : vector<1x128xf32>
    %437 = arith.mulf %424, %426 : vector<4x128xf32>
    %cst_140 = arith.constant dense<0.000000e+00> : vector<128xf32>
    %438 = vector.multi_reduction <add>, %437, %cst_140 [0] : vector<4x128xf32> to vector<128xf32>
    %439 = vector.shape_cast %438 : vector<128xf32> to vector<1x128xf32>
    %cst_141 = arith.constant 2.500000e-01 : f32
    %440 = vector.broadcast %cst_141 : f32 to vector<1x128xf32>
    %441 = arith.mulf %439, %440 : vector<1x128xf32>
    %442 = arith.mulf %431, %436 : vector<1x128xf32>
    %443 = math.sqrt %442 : vector<1x128xf32>
    %cst_142 = arith.constant 9.99999974E-6 : f32
    %444 = vector.broadcast %cst_142 : f32 to vector<1x128xf32>
    %445 = arith.addf %441, %444 : vector<1x128xf32>
    %cst_143 = arith.constant 9.99999974E-6 : f32
    %446 = vector.broadcast %cst_143 : f32 to vector<1x128xf32>
    %447 = arith.addf %443, %446 : vector<1x128xf32>
    %448 = tpu.reciprocal %447 {approx = true} : vector<1x128xf32> -> vector<1x128xf32>
    %449 = arith.mulf %445, %448 : vector<1x128xf32>
    %cst_144 = arith.constant 1.000000e+00 : f32
    %450 = vector.broadcast %cst_144 : f32 to vector<1x128xf32>
    %451 = arith.subf %450, %449 : vector<1x128xf32>
    %452 = arith.addf %383, %451 : vector<1x128xf32>
    %cst_145 = arith.constant dense<0xFF800000> : vector<128xf32>
    %453 = vector.multi_reduction <maximumf>, %413, %cst_145 [0] : vector<4x128xf32> to vector<128xf32>
    %454 = vector.shape_cast %453 : vector<128xf32> to vector<1x128xf32>
    %455 = vector.broadcast %454 : vector<1x128xf32> to vector<4x128xf32>
    %456 = arith.subf %413, %455 : vector<4x128xf32>
    %cst_146 = arith.constant dense<0xFF800000> : vector<128xf32>
    %457 = vector.multi_reduction <maximumf>, %414, %cst_146 [0] : vector<4x128xf32> to vector<128xf32>
    %458 = vector.shape_cast %457 : vector<128xf32> to vector<1x128xf32>
    %459 = vector.broadcast %458 : vector<1x128xf32> to vector<4x128xf32>
    %460 = arith.subf %414, %459 : vector<4x128xf32>
    %461 = math.exp %456 : vector<4x128xf32>
    %cst_147 = arith.constant dense<0.000000e+00> : vector<128xf32>
    %462 = vector.multi_reduction <add>, %461, %cst_147 [0] : vector<4x128xf32> to vector<128xf32>
    %463 = vector.shape_cast %462 : vector<128xf32> to vector<1x128xf32>
    %464 = math.log %463 : vector<1x128xf32>
    %465 = math.exp %460 : vector<4x128xf32>
    %cst_148 = arith.constant dense<0.000000e+00> : vector<128xf32>
    %466 = vector.multi_reduction <add>, %465, %cst_148 [0] : vector<4x128xf32> to vector<128xf32>
    %467 = vector.shape_cast %466 : vector<128xf32> to vector<1x128xf32>
    %468 = math.log %467 : vector<1x128xf32>
    %469 = vector.broadcast %464 : vector<1x128xf32> to vector<4x128xf32>
    %470 = arith.subf %456, %469 : vector<4x128xf32>
    %471 = vector.broadcast %468 : vector<1x128xf32> to vector<4x128xf32>
    %472 = arith.subf %460, %471 : vector<4x128xf32>
    %473 = math.exp %470 : vector<4x128xf32>
    %474 = arith.subf %470, %472 : vector<4x128xf32>
    %475 = arith.mulf %473, %474 : vector<4x128xf32>
    %cst_149 = arith.constant dense<0.000000e+00> : vector<128xf32>
    %476 = vector.multi_reduction <add>, %475, %cst_149 [0] : vector<4x128xf32> to vector<128xf32>
    %477 = vector.shape_cast %476 : vector<128xf32> to vector<1x128xf32>
    %478 = arith.addf %409, %477 : vector<1x128xf32>
    %479 = arith.subf %418, %422 : vector<1x128xf32>
    %480 = math.absf %479 : vector<1x128xf32>
    %481 = arith.addf %412, %480 : vector<1x128xf32>
    %c12 = arith.constant 12 : index
    %c0_150 = arith.constant 0 : index
    %482 = vector.load %arg1[%c12, %c0_150] : memref<16x128xf32, #tpu.memory_space<vmem>>, vector<4x128xf32>
    %c12_151 = arith.constant 12 : index
    %c0_152 = arith.constant 0 : index
    %483 = vector.load %arg2[%c12_151, %c0_152] : memref<16x128xf32, #tpu.memory_space<vmem>>, vector<4x128xf32>
    %cst_153 = arith.constant dense<0.000000e+00> : vector<128xf32>
    %484 = vector.multi_reduction <add>, %482, %cst_153 [0] : vector<4x128xf32> to vector<128xf32>
    %485 = vector.shape_cast %484 : vector<128xf32> to vector<1x128xf32>
    %cst_154 = arith.constant 2.500000e-01 : f32
    %486 = vector.broadcast %cst_154 : f32 to vector<1x128xf32>
    %487 = arith.mulf %485, %486 : vector<1x128xf32>
    %cst_155 = arith.constant dense<0.000000e+00> : vector<128xf32>
    %488 = vector.multi_reduction <add>, %483, %cst_155 [0] : vector<4x128xf32> to vector<128xf32>
    %489 = vector.shape_cast %488 : vector<128xf32> to vector<1x128xf32>
    %cst_156 = arith.constant 2.500000e-01 : f32
    %490 = vector.broadcast %cst_156 : f32 to vector<1x128xf32>
    %491 = arith.mulf %489, %490 : vector<1x128xf32>
    %492 = vector.broadcast %487 : vector<1x128xf32> to vector<4x128xf32>
    %493 = arith.subf %482, %492 : vector<4x128xf32>
    %494 = vector.broadcast %491 : vector<1x128xf32> to vector<4x128xf32>
    %495 = arith.subf %483, %494 : vector<4x128xf32>
    %496 = arith.mulf %493, %493 : vector<4x128xf32>
    %cst_157 = arith.constant dense<0.000000e+00> : vector<128xf32>
    %497 = vector.multi_reduction <add>, %496, %cst_157 [0] : vector<4x128xf32> to vector<128xf32>
    %498 = vector.shape_cast %497 : vector<128xf32> to vector<1x128xf32>
    %cst_158 = arith.constant 2.500000e-01 : f32
    %499 = vector.broadcast %cst_158 : f32 to vector<1x128xf32>
    %500 = arith.mulf %498, %499 : vector<1x128xf32>
    %501 = arith.mulf %495, %495 : vector<4x128xf32>
    %cst_159 = arith.constant dense<0.000000e+00> : vector<128xf32>
    %502 = vector.multi_reduction <add>, %501, %cst_159 [0] : vector<4x128xf32> to vector<128xf32>
    %503 = vector.shape_cast %502 : vector<128xf32> to vector<1x128xf32>
    %cst_160 = arith.constant 2.500000e-01 : f32
    %504 = vector.broadcast %cst_160 : f32 to vector<1x128xf32>
    %505 = arith.mulf %503, %504 : vector<1x128xf32>
    %506 = arith.mulf %493, %495 : vector<4x128xf32>
    %cst_161 = arith.constant dense<0.000000e+00> : vector<128xf32>
    %507 = vector.multi_reduction <add>, %506, %cst_161 [0] : vector<4x128xf32> to vector<128xf32>
    %508 = vector.shape_cast %507 : vector<128xf32> to vector<1x128xf32>
    %cst_162 = arith.constant 2.500000e-01 : f32
    %509 = vector.broadcast %cst_162 : f32 to vector<1x128xf32>
    %510 = arith.mulf %508, %509 : vector<1x128xf32>
    %511 = arith.mulf %500, %505 : vector<1x128xf32>
    %512 = math.sqrt %511 : vector<1x128xf32>
    %cst_163 = arith.constant 9.99999974E-6 : f32
    %513 = vector.broadcast %cst_163 : f32 to vector<1x128xf32>
    %514 = arith.addf %510, %513 : vector<1x128xf32>
    %cst_164 = arith.constant 9.99999974E-6 : f32
    %515 = vector.broadcast %cst_164 : f32 to vector<1x128xf32>
    %516 = arith.addf %512, %515 : vector<1x128xf32>
    %517 = tpu.reciprocal %516 {approx = true} : vector<1x128xf32> -> vector<1x128xf32>
    %518 = arith.mulf %514, %517 : vector<1x128xf32>
    %cst_165 = arith.constant 1.000000e+00 : f32
    %519 = vector.broadcast %cst_165 : f32 to vector<1x128xf32>
    %520 = arith.subf %519, %518 : vector<1x128xf32>
    %521 = arith.addf %452, %520 : vector<1x128xf32>
    %cst_166 = arith.constant dense<0xFF800000> : vector<128xf32>
    %522 = vector.multi_reduction <maximumf>, %482, %cst_166 [0] : vector<4x128xf32> to vector<128xf32>
    %523 = vector.shape_cast %522 : vector<128xf32> to vector<1x128xf32>
    %524 = vector.broadcast %523 : vector<1x128xf32> to vector<4x128xf32>
    %525 = arith.subf %482, %524 : vector<4x128xf32>
    %cst_167 = arith.constant dense<0xFF800000> : vector<128xf32>
    %526 = vector.multi_reduction <maximumf>, %483, %cst_167 [0] : vector<4x128xf32> to vector<128xf32>
    %527 = vector.shape_cast %526 : vector<128xf32> to vector<1x128xf32>
    %528 = vector.broadcast %527 : vector<1x128xf32> to vector<4x128xf32>
    %529 = arith.subf %483, %528 : vector<4x128xf32>
    %530 = math.exp %525 : vector<4x128xf32>
    %cst_168 = arith.constant dense<0.000000e+00> : vector<128xf32>
    %531 = vector.multi_reduction <add>, %530, %cst_168 [0] : vector<4x128xf32> to vector<128xf32>
    %532 = vector.shape_cast %531 : vector<128xf32> to vector<1x128xf32>
    %533 = math.log %532 : vector<1x128xf32>
    %534 = math.exp %529 : vector<4x128xf32>
    %cst_169 = arith.constant dense<0.000000e+00> : vector<128xf32>
    %535 = vector.multi_reduction <add>, %534, %cst_169 [0] : vector<4x128xf32> to vector<128xf32>
    %536 = vector.shape_cast %535 : vector<128xf32> to vector<1x128xf32>
    %537 = math.log %536 : vector<1x128xf32>
    %538 = vector.broadcast %533 : vector<1x128xf32> to vector<4x128xf32>
    %539 = arith.subf %525, %538 : vector<4x128xf32>
    %540 = vector.broadcast %537 : vector<1x128xf32> to vector<4x128xf32>
    %541 = arith.subf %529, %540 : vector<4x128xf32>
    %542 = math.exp %539 : vector<4x128xf32>
    %543 = arith.subf %539, %541 : vector<4x128xf32>
    %544 = arith.mulf %542, %543 : vector<4x128xf32>
    %cst_170 = arith.constant dense<0.000000e+00> : vector<128xf32>
    %545 = vector.multi_reduction <add>, %544, %cst_170 [0] : vector<4x128xf32> to vector<128xf32>
    %546 = vector.shape_cast %545 : vector<128xf32> to vector<1x128xf32>
    %547 = arith.addf %478, %546 : vector<1x128xf32>
    %548 = arith.subf %487, %491 : vector<1x128xf32>
    %549 = math.absf %548 : vector<1x128xf32>
    %550 = arith.addf %481, %549 : vector<1x128xf32>
    %551 = arith.mulf %521, %7 : vector<1x128xf32>
    %552 = arith.mulf %547, %7 : vector<1x128xf32>
    %553 = arith.mulf %550, %7 : vector<1x128xf32>
    %cst_171 = arith.constant 0.000000e+00 : f32
    %554 = vector.broadcast %cst_171 : f32 to vector<3x128xf32>
    %555 = tpu.concatenate %551, %552, %553, %60, %64, %554 in 0 : vector<1x128xf32>, vector<1x128xf32>, vector<1x128xf32>, vector<1x128xf32>, vector<1x128xf32>, vector<3x128xf32> -> vector<8x128xf32>
    %556 = vector.shape_cast %555 : vector<8x128xf32> to vector<1x8x128xf32>
    %c0_172 = arith.constant 0 : index
    %c0_173 = arith.constant 0 : index
    %c0_174 = arith.constant 0 : index
    %557 = vector.load %arg3[%c0_172, %c0_173, %c0_174] : memref<1x8x128xf32, #tpu.memory_space<vmem>>, vector<1x8x128xf32>
    tpu.vector_store %arg3[%c0_172, %c0_173, %c0_174], %556 {strides = array<i32>} : memref<1x8x128xf32, #tpu.memory_space<vmem>>, vector<1x8x128xf32>,
    return
  }
  func.func @transform_0(%arg0: i32) -> (i32, i32) {
    %c0_i32 = arith.constant 0 : i32
    %c0_i32_0 = arith.constant 0 : i32
    return %c0_i32, %arg0 : i32, i32
  }
  func.func @transform_1(%arg0: i32) -> (i32, i32) {
    %c0_i32 = arith.constant 0 : i32
    %c0_i32_0 = arith.constant 0 : i32
    return %c0_i32, %arg0 : i32, i32
  }
  func.func @transform_2(%arg0: i32) -> (i32, i32, i32) {
    %c0_i32 = arith.constant 0 : i32
    %c0_i32_0 = arith.constant 0 : i32
    %c0_i32_1 = arith.constant 0 : i32
    return %arg0, %c0_i32, %c0_i32_0 : i32, i32, i32
  }
}

</mosaic_0001>

<bundles_post_ra>
// kernel: tpu_custom_call.1
= control target key start
LH: loop header
LB: loop body
LE: loop exit
PB: predicated region body
PF: predicated region fallthrough
CT: control target
= control target key end

     0   :  { %7 = vsyncpa [#allocation3], 0  ;;  %s1839_s0 = inlined_call_operand.hbm [shape: f32[16,128], index: 0, kind: input, shape index: {}]   ;;  %s1840_s1 = inlined_call_operand.hbm [shape: f32[16,128], index: 1, kind: input, shape index: {}]   ;;  %s1841_s2 = inlined_call_operand.hbm [shape: f32[1,8,128], index: 2, kind: output, shape index: {}]  }
   0x1   :  { %8 = vsyncpa [#allocation6], 0 }
   0x2   :  { %9 = vsyncpa [#allocation4], 0  ;;  %s14_s11 = sshll.u32 %s1839_s0, 4  ;;  %s1213_s12 = smov [#allocation2]   ;;  %s15_s11 = int_to_ptr.hbm [resolvable:$true] %s14_s11 }
   0x3   :  { %s16_s13 = sshll.u32 %s1213_s12, 4  ;;  %s27_s16 = sshll.u32 %s1840_s1, 4  ;;  %s17_s13 = int_to_ptr.vmem [resolvable:$true] %s16_s13  ;;  %s28_s16 = int_to_ptr.hbm [resolvable:$true] %s27_s16 }
   0x4   :  { %s1214_s17 = smov 128   ;;  %s1215_s18 = smov 8  }
   0x5   :  { %22 = dma.hbm_to_vmem [thread:$0]  %s15_s11, 256, %s17_s13, [#allocation3], %s1214_s17, %s1214_s17, %s1215_s18  }
   0x6   :  { %s1216_s19 = smov [#allocation5]  }
   0x7   :  { %s29_s20 = sshll.u32 %s1216_s19, 4  ;;  %s30_s20 = int_to_ptr.vmem [resolvable:$true] %s29_s20 }
   0x8   :  { %35 = dma.hbm_to_vmem [thread:$0]  %s28_s16, 256, %s30_s20, [#allocation6], %s1214_s17, %s1214_s17, %s1215_s18  }
   0x9   :  { %1207 = dma.done.wait [#allocation3], 256  }
   0xa   :  { %1208 = vsyncadd [#allocation3], 4294967040 }
   0xb   :  { %1209 = dma.done.wait [#allocation6], 256  }
   0xc   :  { %1210 = vsyncadd [#allocation6], 4294967040  ;;  %v1240_v0 = vld [vmem:[#allocation2] sm:$0xff]  ;;  %v1242_v1 = vld [vmem:[#allocation2 + $0x8] sm:$0xff]  ;;  %vm147_vm0 = vcmask 1043456   ;;  %s1218_s0 = smov [#allocation7]  }
   0xd   :  { %v1244_v2 = vld [vmem:[#allocation5] sm:$0xff]  ;;  %v1246_v3 = vld [vmem:[#allocation5 + $0x8] sm:$0xff]  ;;  %v56_v4 = vadd.f32 %v1242_v1, %v1240_v0  ;;  %v1250_v5 = vld [vmem:[#allocation2] sm:$0xf]  ;;  %s1011_s1 = sshll.u32 %s1218_s0, 4  ;;  %s1013_s23 = sshll.u32 %s1841_s2, 4  ;;  %s1012_s1 = int_to_ptr.vmem [resolvable:$true] %s1011_s1  ;;  %s1014_s23 = int_to_ptr.hbm [resolvable:$true] %s1013_s23 }
   0xe   :  { %v1252_v6 = vld [vmem:[#allocation5] sm:$0xf]  ;;  %v64_v7 = vadd.f32 %v1246_v3, %v1244_v2  ;;  %v148_v8 = vsel %vm147_vm0, %v1250_v5, 0.0  ;;  %v212_v21 = vsel %vm147_vm0, %v1250_v5, -inf  ;;  %v1264_v22 = vld [vmem:[#allocation2 + $0x2] sm:$0xf] }
   0xf   :  { %v156_v9 = vsel %vm147_vm0, %v1252_v6, 0.0  ;;  %v57_v10 = vrot.slane %v56_v4, 4  ;;  %v149_v11 = vrot.slane %v148_v8, 4  ;;  %v1260_v20 = vld [vmem:[#allocation5 + $0x2] sm:$0xf]  ;;  %v269_v24 = vsel %vm147_vm0, %v1264_v22, 0.0 }
  0x10   :  { %v157_v12 = vrot.slane %v156_v9, 4  ;;  %v65_v13 = vrot.slane %v64_v7, 4  ;;  %v277_v26 = vsel %vm147_vm0, %v1260_v20, 0.0  ;;  %v213_v29 = vrot.slane %v212_v21, 4 }
  0x11   :  { %v58_v14 = vadd.f32 %v57_v10, %v56_v4  ;;  %v150_v15 = vadd.f32 %v149_v11, %v148_v8  ;;  %v270_v30 = vrot.slane %v269_v24, 4  ;;  %v278_v32 = vrot.slane %v277_v26, 4 }
  0x12   :  { %v158_v16 = vadd.f32 %v157_v12, %v156_v9  ;;  %v66_v17 = vadd.f32 %v65_v13, %v64_v7  ;;  %v214_v36 = vmax.f32 %v212_v21, %v213_v29  ;;  %v220_v41 = vsel %vm147_vm0, %v1252_v6, -inf }
  0x13   :  { %v151_v18 = vrot.slane %v150_v15, 2  ;;  %v59_v23 = vrot.slane %v58_v14, 2  ;;  %v271_v37 = vadd.f32 %v270_v30, %v269_v24  ;;  %v279_v39 = vadd.f32 %v278_v32, %v277_v26 }
  0x14   :  { %v159_v19 = vrot.slane %v158_v16, 2  ;;  %v67_v25 = vrot.slane %v66_v17, 2  ;;  %v215_v44 = vrot.slane %v214_v36, 2  ;;  %v221_v47 = vrot.slane %v220_v41, 4 }
  0x15   :  { %v152_v27 = vadd.f32 %v151_v18, %v150_v15  ;;  %v60_v31 = vadd.f32 %v59_v23, %v58_v14  ;;  %v272_v45 = vrot.slane %v271_v37, 2  ;;  %v280_v48 = vrot.slane %v279_v39, 2 }
  0x16   :  { %v160_v28 = vadd.f32 %v159_v19, %v158_v16  ;;  %v68_v33 = vadd.f32 %v67_v25, %v66_v17  ;;  %v216_v52 = vmax.f32 %v214_v36, %v215_v44  ;;  %v222_v55 = vmax.f32 %v220_v41, %v221_v47 }
  0x17   :  { %v153_v34 = vrot.slane %v152_v27, 1  ;;  %v61_v38 = vrot.slane %v60_v31, 1  ;;  %v273_v53 = vadd.f32 %v272_v45, %v271_v37  ;;  %v281_v56 = vadd.f32 %v280_v48, %v279_v39 }
  0x18   :  { %v161_v35 = vrot.slane %v160_v28, 1  ;;  %v69_v40 = vrot.slane %v68_v33, 1  ;;  %v217_v60 = vrot.slane %v216_v52, 1  ;;  %v223_v4 = vrot.slane %v222_v55, 2 }
  0x19   :  { %v154_v42 = vadd.f32 %v153_v34, %v152_v27  ;;  %v62_v46 = vadd.f32 %v61_v38, %v60_v31  ;;  %v274_v61 = vrot.slane %v273_v53, 1  ;;  %v282_v7 = vrot.slane %v281_v56, 1 }
  0x1a   :  { %v162_v43 = vadd.f32 %v161_v35, %v160_v28  ;;  %v70_v49 = vadd.f32 %v69_v40, %v68_v33  ;;  %v218_v12 = vmax.f32 %v216_v52, %v217_v60  ;;  %v224_v16 = vmax.f32 %v222_v55, %v223_v4 }
  0x1b   :  { %v1272_v50 = vmul.f32 0.25, %v154_v42  ;;  %v63_v54 = vmul.f32 0.0625, %v62_v46  ;;  %v275_v13 = vadd.f32 %v274_v61, %v273_v53  ;;  %v283_v17 = vadd.f32 %v282_v7, %v281_v56 }
  0x1c   :  { %v1274_v51 = vmul.f32 0.25, %v162_v43  ;;  %v71_v57 = vmul.f32 0.0625, %v70_v49  ;;  %v1295_v24 = vsub.f32 %v1250_v5, %v218_v12  ;;  %v225_v27 = vrot.slane %v224_v16, 1 }
  0x1d   :  { %v1278_v58 = vsub.f32 %v1250_v5, %v1272_v50  ;;  %v72_v62 = vsub.f32 %v1240_v0, %v63_v54  ;;  %v73_v63 = vsub.f32 %v1242_v1, %v63_v54  ;;  %v1297_v25 = vmul.f32 0.25, %v275_v13 }
  0x1e   :  { %v1282_v59 = vsub.f32 %v1252_v6, %v1274_v51  ;;  %v74_v8 = vsub.f32 %v1244_v2, %v71_v57  ;;  %v75_v9 = vsub.f32 %v1246_v3, %v71_v57  ;;  %v1299_v28 = vmul.f32 0.25, %v283_v17 }
  0x1f   :  { %v166_v10 = vmul.f32 %v1278_v58, %v1278_v58  ;;  %v76_v14 = vmul.f32 %v72_v62, %v72_v62  ;;  %v77_v15 = vmul.f32 %v73_v63, %v73_v63  ;;  %v228_v32 = vmul.f32 1.442695, %v1295_v24 }
  0x20   :  { %v175_v11 = vmul.f32 %v1282_v59, %v1282_v59  ;;  %v86_v18 = vmul.f32 %v74_v8, %v74_v8  ;;  %v87_v19 = vmul.f32 %v75_v9, %v75_v9  ;;  %v1304_v33 = vsub.f32 %v1264_v22, %v1297_v25 }
  0x21   :  { %v167_v21 = vsel %vm147_vm0, %v166_v10, 0.0  ;;  %v78_v26 = vadd.f32 %v77_v15, %v76_v14  ;;  %v226_v35 = vmax.f32 %v224_v16, %v225_v27  ;;  %v1308_v5 = vsub.f32 %v1260_v20, %v1299_v28 }
  0x22   :  { %v176_v23 = vsel %vm147_vm0, %v175_v11, 0.0  ;;  %v88_v29 = vadd.f32 %v87_v19, %v86_v18  ;;  %v168_v30 = vrot.slane %v167_v21, 4  ;;  %1031 = vpow2.f32 %v228_v32 }
  0x23   :  { %v177_v31 = vrot.slane %v176_v23, 4  ;;  %v79_v34 = vrot.slane %v78_v26, 4  ;;  %v287_v39 = vmul.f32 %v1304_v33, %v1304_v33  ;;  %v1313_v41 = vsub.f32 %v1252_v6, %v226_v35 }
  0x24   :  { %v89_v36 = vrot.slane %v88_v29, 4  ;;  %v169_v37 = vadd.f32 %v168_v30, %v167_v21  ;;  %v296_v42 = vmul.f32 %v1308_v5, %v1308_v5  ;;  %v333_v53 = vsel %vm147_vm0, %v1264_v22, -inf }
  0x25   :  { %v178_v38 = vadd.f32 %v177_v31, %v176_v23  ;;  %v80_v40 = vadd.f32 %v79_v34, %v78_v26  ;;  %v288_v46 = vsel %vm147_vm0, %v287_v39, 0.0  ;;  %v239_v49 = vmul.f32 1.442695, %v1313_v41 }
  0x26   :  { %v90_v43 = vadd.f32 %v89_v36, %v88_v29  ;;  %v170_v44 = vrot.slane %v169_v37, 2  ;;  %v297_v52 = vsel %vm147_vm0, %v296_v42, 0.0  ;;  %v289_v56 = vrot.slane %v288_v46, 4 }
  0x27   :  { %v179_v45 = vrot.slane %v178_v38, 2  ;;  %v81_v48 = vrot.slane %v80_v40, 2  ;;  %v298_v60 = vrot.slane %v297_v52, 4  ;;  %v334_v61 = vrot.slane %v333_v53, 4 }
  0x28   :  { %v1032_v47 = vpop.eup %1031  ;;  %v91_v54 = vrot.slane %v90_v43, 2  ;;  %v171_v6 = vadd.f32 %v170_v44, %v169_v37  ;;  %1033 = vpow2.f32 %v239_v49  ;;  %v341_v7 = vsel %vm147_vm0, %v1260_v20, -inf }
  0x29   :  { %v180_v55 = vadd.f32 %v179_v45, %v178_v38  ;;  %v230_v57 = vsel %vm147_vm0, %v1032_v47, 0.0  ;;  %v82_v4 = vadd.f32 %v81_v48, %v80_v40  ;;  %v335_v13 = vmax.f32 %v333_v53, %v334_v61  ;;  %v1331_v45 = vld [vmem:[#allocation2 + $0x4] sm:$0xf] }
  0x2a   :  { %v92_v10 = vadd.f32 %v91_v54, %v90_v43  ;;  %v172_v11 = vrot.slane %v171_v6, 1  ;;  %v96_v14 = vmul.f32 %v74_v8, %v72_v62  ;;  %v97_v15 = vmul.f32 %v75_v9, %v73_v63  ;;  %v1328_v9 = vld [vmem:[#allocation5 + $0x4] sm:$0xf] }
  0x2b   :  { %v181_v12 = vrot.slane %v180_v55, 1  ;;  %v231_v16 = vrot.slane %v230_v57, 4  ;;  %v290_v17 = vadd.f32 %v289_v56, %v288_v46  ;;  %v299_v18 = vadd.f32 %v298_v60, %v297_v52 }
  0x2c   :  { %v336_v19 = vrot.slane %v335_v13, 2  ;;  %v342_v21 = vrot.slane %v341_v7, 4  ;;  %v83_v23 = vrot.slane %v82_v4, 1  ;;  %v184_v26 = vmul.f32 %v1282_v59, %v1278_v58 }
  0x2d   :  { %v93_v27 = vrot.slane %v92_v10, 1  ;;  %v173_v29 = vadd.f32 %v172_v11, %v171_v6  ;;  %v182_v30 = vadd.f32 %v181_v12, %v180_v55  ;;  %v98_v32 = vadd.f32 %v97_v15, %v96_v14 }
  0x2e   :  { %v1034_v31 = vpop.eup %1033  ;;  %v232_v34 = vadd.f32 %v231_v16, %v230_v57  ;;  %v291_v35 = vrot.slane %v290_v17, 2  ;;  %v337_v36 = vmax.f32 %v335_v13, %v336_v19  ;;  %v300_v37 = vrot.slane %v299_v18, 2 }
  0x2f   :  { %v343_v62 = vmax.f32 %v341_v7, %v342_v21  ;;  %v84_v63 = vadd.f32 %v83_v23, %v82_v4  ;;  %v185_v8 = vsel %vm147_vm0, %v184_v26, 0.0  ;;  %v94_v38 = vadd.f32 %v93_v27, %v92_v10 }
  0x30   :  { %v174_v39 = vmul.f32 0.25, %v173_v29  ;;  %v183_v40 = vmul.f32 0.25, %v182_v30  ;;  %v241_v58 = vsel %vm147_vm0, %v1034_v31, 0.0  ;;  %v99_v59 = vrot.slane %v98_v32, 4 }
  0x31   :  { %v233_v42 = vrot.slane %v232_v34, 2  ;;  %v292_v43 = vadd.f32 %v291_v35, %v290_v17  ;;  %v338_v44 = vrot.slane %v337_v36, 1  ;;  %v301_v46 = vadd.f32 %v300_v37, %v299_v18 }
  0x32   :  { %v344_v47 = vrot.slane %v343_v62, 2  ;;  %v390_v48 = vsel %vm147_vm0, %v1331_v45, 0.0  ;;  %v398_v49 = vsel %vm147_vm0, %v1328_v9, 0.0  ;;  %v186_v52 = vrot.slane %v185_v8, 4 }
  0x33   :  { %v242_v53 = vrot.slane %v241_v58, 4  ;;  %v391_v54 = vrot.slane %v390_v48, 4  ;;  %v399_v6 = vrot.slane %v398_v49, 4  ;;  %v1337_v55 = vmul.f32 0.0625, %v84_v63 }
  0x34   :  { %v1339_v56 = vmul.f32 0.0625, %v94_v38  ;;  %v1341_v57 = vmul.f32 %v183_v40, %v174_v39  ;;  %v345_v60 = vmax.f32 %v343_v62, %v344_v47  ;;  %v234_v61 = vadd.f32 %v233_v42, %v232_v34 }
  0x35   :  { %v339_v4 = vmax.f32 %v337_v36, %v338_v44  ;;  %v392_v7 = vadd.f32 %v391_v54, %v390_v48  ;;  %v400_v10 = vadd.f32 %v399_v6, %v398_v49  ;;  %v293_v11 = vrot.slane %v292_v43, 1 }
  0x36   :  { %v302_v12 = vrot.slane %v301_v46, 1  ;;  %v100_v13 = vadd.f32 %v99_v59, %v98_v32  ;;  %v243_v14 = vadd.f32 %v242_v53, %v241_v58  ;;  %v1345_v16 = vmul.f32 %v1339_v56, %v1337_v55 }
  0x37   :  { %v393_v15 = vrot.slane %v392_v7, 2  ;;  %v187_v17 = vadd.f32 %v186_v52, %v185_v8  ;;  %v346_v18 = vrot.slane %v345_v60, 1  ;;  %v401_v19 = vrot.slane %v400_v10, 2 }
  0x38   :  { %1035 = vrsqrt.f32 %v1341_v57  ;;  %v235_v21 = vrot.slane %v234_v61, 1  ;;  %v1349_v23 = vsub.f32 %v1264_v22, %v339_v4  ;;  %v454_v26 = vsel %vm147_vm0, %v1331_v45, -inf }
  0x39   :  { %v294_v27 = vadd.f32 %v293_v11, %v292_v43  ;;  %v303_v29 = vadd.f32 %v302_v12, %v301_v46  ;;  %v394_v30 = vadd.f32 %v393_v15, %v392_v7  ;;  %v402_v31 = vadd.f32 %v401_v19, %v400_v10 }
  0x3a   :  { %v101_v32 = vrot.slane %v100_v13, 2  ;;  %v244_v34 = vrot.slane %v243_v14, 2  ;;  %v188_v35 = vrot.slane %v187_v17, 2  ;;  %v347_v36 = vmax.f32 %v345_v60, %v346_v18 }
  0x3b   :  { %v455_v37 = vrot.slane %v454_v26, 4  ;;  %1037 = vrsqrt.f32 %v1345_v16  ;;  %v349_v62 = vmul.f32 1.442695, %v1349_v23  ;;  %v395_v63 = vrot.slane %v394_v30, 1 }
  0x3c   :  { %v236_v8 = vadd.f32 %v235_v21, %v234_v61  ;;  %v295_v22 = vmul.f32 0.25, %v294_v27  ;;  %v304_v38 = vmul.f32 0.25, %v303_v29  ;;  %v403_v39 = vrot.slane %v402_v31, 1 }
  0x3d   :  { %v102_v58 = vadd.f32 %v101_v32, %v100_v13  ;;  %v245_v59 = vadd.f32 %v244_v34, %v243_v14  ;;  %v189_v42 = vadd.f32 %v188_v35, %v187_v17  ;;  %v1358_v43 = vsub.f32 %v1260_v20, %v347_v36 }
  0x3e   :  { %v1355_v40 = vpop.eup %1035  ;;  %v456_v44 = vmax.f32 %v454_v26, %v455_v37  ;;  %v462_v46 = vsel %vm147_vm0, %v1328_v9, -inf  ;;  %v305_v47 = vmul.f32 %v1308_v5, %v1304_v33  ;;  %1039 = vpow2.f32 %v349_v62 }
  0x3f   :  { %v396_v48 = vadd.f32 %v395_v63, %v394_v30  ;;  %v195_v49 = vmul.f32 %v1355_v40, %v1341_v57  ;;  %1041 = vlog2.f32 %v236_v8  ;;  %v1366_v52 = vmul.f32 %v304_v38, %v295_v22 }
  0x40   :  { %v404_v53 = vadd.f32 %v403_v39, %v402_v31  ;;  %v246_v20 = vrot.slane %v245_v59, 1  ;;  %v463_v6 = vrot.slane %v462_v46, 4  ;;  %v103_v60 = vrot.slane %v102_v58, 1 }
  0x41   :  { %v1368_v54 = vpop.eup %1037  ;;  %v190_v61 = vrot.slane %v189_v42, 1  ;;  %v360_v4 = vmul.f32 1.442695, %v1358_v43  ;;  %v457_v7 = vrot.slane %v456_v44, 2  ;;  %v306_v33 = vsel %vm147_vm0, %v305_v47, 0.0 }
  0x42   :  { %v1372_v5 = vmul.f32 0.25, %v396_v48  ;;  %v108_v10 = vmul.f32 %v1368_v54, %v1345_v16  ;;  %v196_v11 = vmul.f32 %v1355_v40, %v195_v49  ;;  %1043 = vrsqrt.f32 %v1366_v52 }
  0x43   :  { %v1378_v12 = vmul.f32 0.25, %v404_v53  ;;  %v247_v14 = vadd.f32 %v246_v20, %v245_v59  ;;  %v464_v15 = vmax.f32 %v462_v46, %v463_v6  ;;  %v104_v18 = vadd.f32 %v103_v60, %v102_v58  ;;  %v1400_v58 = vld [vmem:[#allocation2 + $0x6] sm:$0xf]  ;;  %v1402_v59 = vld [vmem:[#allocation5 + $0x6] sm:$0xf] }
  0x44   :  { %v1040_v13 = vpop.eup %1039  ;;  %v191_v19 = vadd.f32 %v190_v61, %v189_v42  ;;  %1045 = vpow2.f32 %v360_v4  ;;  %v458_v21 = vmax.f32 %v456_v44, %v457_v7  ;;  %v307_v26 = vrot.slane %v306_v33, 4 }
  0x45   :  { %v1042_v17 = vpop.eup %1041  ;;  %v1382_v27 = vsub.f32 %v1331_v45, %v1372_v5  ;;  %v109_v29 = vmul.f32 %v1368_v54, %v108_v10  ;;  %v197_v30 = vmul.f32 0.5, %v196_v11  ;;  %v351_v31 = vsel %vm147_vm0, %v1040_v13, 0.0 }
  0x46   :  { %v1388_v32 = vsub.f32 %v1328_v9, %v1378_v12  ;;  %v238_v34 = vmul.f32 0.6931472, %v1042_v17  ;;  %1047 = vlog2.f32 %v247_v14  ;;  %v465_v35 = vrot.slane %v464_v15, 2 }
  0x47   :  { %v1392_v37 = vmul.f32 0.0625, %v104_v18  ;;  %v1394_v62 = vmul.f32 0.25, %v191_v19  ;;  %v459_v63 = vrot.slane %v458_v21, 1  ;;  %v131_v8 = vsub.f32 %v1244_v2, %v1240_v0 }
  0x48   :  { %v1390_v36 = vpop.eup %1043  ;;  %v308_v22 = vadd.f32 %v307_v26, %v306_v33  ;;  %v352_v38 = vrot.slane %v351_v31, 4  ;;  %v408_v39 = vmul.f32 %v1382_v27, %v1382_v27  ;;  %v110_v44 = vmul.f32 0.5, %v109_v29 }
  0x49   :  { %v198_v46 = vsub.f32 1.5, %v197_v30  ;;  %v417_v47 = vmul.f32 %v1388_v32, %v1388_v32  ;;  %v511_v48 = vsel %vm147_vm0, %v1400_v58, 0.0  ;;  %v132_v0 = vsub.f32 %v1246_v3, %v1242_v1 }
  0x4a   :  { %v1046_v42 = vpop.eup %1045  ;;  %v250_v2 = vsub.f32 %v1295_v24, %v238_v34  ;;  %v316_v49 = vmul.f32 %v1390_v36, %v1366_v52  ;;  %v466_v53 = vmax.f32 %v464_v15, %v465_v35  ;;  %vm201_vm1 = vcmp.eq.f32.partialorder %v1341_v57, inf }
  0x4b   :  { %v204_v20 = vand.u32 2147483648, %v1341_v57  ;;  %v460_v6 = vmax.f32 %v458_v21, %v459_v63  ;;  %v519_v60 = vsel %vm147_vm0, %v1402_v59, 0.0  ;;  %v353_v4 = vadd.f32 %v352_v38, %v351_v31 }
  0x4c   :  { %v1048_v61 = vpop.eup %1047  ;;  %v362_v7 = vsel %vm147_vm0, %v1046_v42, 0.0  ;;  %v409_v1 = vsel %vm147_vm0, %v408_v39, 0.0  ;;  %v512_v3 = vrot.slane %v511_v48, 4  ;;  %v111_v24 = vsub.f32 1.5, %v110_v44 }
  0x4d   :  { %v199_v33 = vmul.f32 %v1355_v40, %v198_v46  ;;  %v309_v10 = vrot.slane %v308_v22, 2  ;;  %v418_v11 = vsel %vm147_vm0, %v417_v47, 0.0  ;;  %vm114_vm2 = vcmp.eq.f32.partialorder %v1345_v16, inf }
  0x4e   :  { %vm203_vm3 = vcmp.eq.f32.partialorder %v1341_v57, 0.0  ;;  %v252_v13 = vmul.f32 1.442695, %v250_v2  ;;  %v317_v14 = vmul.f32 %v1390_v36, %v316_v49  ;;  %v467_v15 = vrot.slane %v466_v53, 1 }
  0x4f   :  { %v520_v17 = vrot.slane %v519_v60, 4  ;;  %v249_v18 = vmul.f32 0.6931472, %v1048_v61  ;;  %v363_v19 = vrot.slane %v362_v7, 4  ;;  %v410_v21 = vrot.slane %v409_v1, 4 }
  0x50   :  { %v1425_v26 = vsub.f32 %v1331_v45, %v460_v6  ;;  %v135_v29 = vmul.f32 %v131_v8, %v131_v8  ;;  %v354_v40 = vrot.slane %v353_v4, 2  ;;  %v419_v30 = vrot.slane %v418_v11, 4 }
  0x51   :  { %v513_v31 = vadd.f32 %v512_v3, %v511_v48  ;;  %v112_v34 = vmul.f32 %v1368_v54, %v111_v24  ;;  %v136_v35 = vmul.f32 %v132_v0, %v132_v0  ;;  %v200_v63 = vmul.f32 %v199_v33, %v1341_v57 }
  0x52   :  { %v310_v38 = vadd.f32 %v309_v10, %v308_v22  ;;  %vm116_vm4 = vcmp.eq.f32.partialorder %v1345_v16, 0.0  ;;  %1049 = vpow2.f32 %v252_v13  ;;  %v318_v39 = vmul.f32 0.5, %v317_v14 }
  0x53   :  { %v468_v42 = vmax.f32 %v466_v53, %v467_v15  ;;  %v521_v44 = vadd.f32 %v520_v17, %v519_v60  ;;  %v251_v46 = vsub.f32 %v1313_v41, %v249_v18  ;;  %v364_v45 = vadd.f32 %v363_v19, %v362_v7 }
  0x54   :  { %v411_v47 = vadd.f32 %v410_v21, %v409_v1  ;;  %v470_v8 = vmul.f32 1.442695, %v1425_v26  ;;  %v117_v48 = vand.u32 2147483648, %v1345_v16  ;;  %v355_v49 = vadd.f32 %v354_v40, %v353_v4 }
  0x55   :  { %v420_v54 = vadd.f32 %v419_v30, %v418_v11  ;;  %v514_v0 = vrot.slane %v513_v31, 2  ;;  %v113_v6 = vmul.f32 %v112_v34, %v1345_v16  ;;  %v1436_v22 = vadd.f32 %v1339_v56, %v1337_v55 }
  0x56   :  { %v1438_v61 = vadd.f32 %v136_v35, %v135_v29  ;;  %v311_v53 = vrot.slane %v310_v38, 1  ;;  %v202_v41 = vsel %vm201_vm1, %v1341_v57, %v200_v63  ;;  %v319_v60 = vsub.f32 1.5, %v318_v39 }
  0x57   :  { %v1444_v7 = vsub.f32 %v1328_v9, %v468_v42  ;;  %v522_v4 = vrot.slane %v521_v44, 2  ;;  %v254_v1 = vsub.f32 %v250_v2, %v251_v46  ;;  %v365_v3 = vrot.slane %v364_v45, 2 }
  0x58   :  { %1847 = vst [vmem:[#allocation11_spill] sm:$0xff] %v1438_v61  ;;  %v412_v24 = vrot.slane %v411_v47, 2  ;;  %1051 = vpow2.f32 %v470_v8  ;;  %v1050_v33 = vpop.eup %1049  ;;  %v264_v55 = vsub.f32 %v1272_v50, %v1274_v51  ;;  %v356_v56 = vrot.slane %v355_v49, 1  ;;  %v1475_v8 = vld [vmem:[#allocation2 + $0x8] sm:$0xf] }
  0x59   :  { %v421_v10 = vrot.slane %v420_v54, 2  ;;  %v515_v11 = vadd.f32 %v514_v0, %v513_v31  ;;  %v115_v13 = vsel %vm114_vm2, %v1345_v16, %v113_v6  ;;  %v205_v9 = vsel %vm203_vm3, %v204_v20, %v202_v41 }
  0x5a   :  { %v1454_v14 = vadd.f32 1e-05, %v1394_v62  ;;  %v312_v2 = vadd.f32 %v311_v53, %v310_v38  ;;  %v320_v15 = vmul.f32 %v1390_v36, %v319_v60  ;;  %v481_v17 = vmul.f32 1.442695, %v1444_v7  ;;  %v1486_v53 = vld [vmem:[#allocation5 + $0x8] sm:$0xf] }
  0x5b   :  { %v523_v18 = vadd.f32 %v522_v4, %v521_v44  ;;  %v575_v50 = vsel %vm147_vm0, %v1400_v58, -inf  ;;  %v255_v19 = vmul.f32 %v1050_v33, %v254_v1  ;;  %v366_v21 = vadd.f32 %v365_v3, %v364_v45 }
  0x5c   :  { %v413_v29 = vadd.f32 %v412_v24, %v411_v47  ;;  %v1461_v40 = vand.u32 2147483647, %v264_v55  ;;  %v357_v57 = vadd.f32 %v356_v56, %v355_v49  ;;  %v422_v20 = vadd.f32 %v421_v10, %v420_v54 }
  0x5d   :  { %v516_v62 = vrot.slane %v515_v11, 1  ;;  %v1465_v36 = vsel %vm116_vm4, %v117_v48, %v115_v13  ;;  %v207_v31 = vadd.f32 1e-05, %v205_v9  ;;  %v1467_v34 = vmul.f32 0.25, %v312_v2 }
  0x5e   :  { %v1052_v30 = vpop.eup %1051  ;;  %1848 = vst [vmem:[#allocation12_spill] sm:$0xff] %v1465_v36  ;;  %v576_v35 = vrot.slane %v575_v50, 4  ;;  %v321_v63 = vmul.f32 %v320_v15, %v1366_v52  ;;  %vm322_vm5 = vcmp.eq.f32.partialorder %v1366_v52, inf  ;;  %1053 = vpow2.f32 %v481_v17 }
  0x5f   :  { %v524_v38 = vrot.slane %v523_v18, 1  ;;  %v256_v39 = vsel %vm147_vm0, %v255_v19, 0.0  ;;  %v367_v42 = vrot.slane %v366_v21, 1  ;;  %v414_v44 = vrot.slane %v413_v29, 1 }
  0x60   :  { %v426_v46 = vmul.f32 %v1388_v32, %v1382_v27  ;;  %1055 = vlog2.f32 %v357_v57  ;;  %v423_v16 = vrot.slane %v422_v20, 1  ;;  %v472_v45 = vsel %vm147_vm0, %v1052_v30, 0.0 }
  0x61   :  { %v517_v47 = vadd.f32 %v516_v62, %v515_v11  ;;  %vm324_vm6 = vcmp.eq.f32.partialorder %v1366_v52, 0.0  ;;  %v325_v48 = vand.u32 2147483648, %v1366_v52  ;;  %v577_v49 = vmax.f32 %v575_v50, %v576_v35 }
  0x62   :  { %v632_v54 = vsel %vm147_vm0, %v1475_v8, 0.0  ;;  %v257_v0 = vrot.slane %v256_v39, 4  ;;  %v323_v27 = vsel %vm322_vm5, %v1366_v52, %v321_v63  ;;  %v525_v32 = vadd.f32 %v524_v38, %v523_v18 }
  0x63   :  { %v583_v6 = vsel %vm147_vm0, %v1402_v59, -inf  ;;  %v368_v41 = vadd.f32 %v367_v42, %v366_v21  ;;  %v415_v60 = vadd.f32 %v414_v44, %v413_v29  ;;  %v427_v4 = vsel %vm147_vm0, %v426_v46, 0.0 }
  0x64   :  { %v473_v1 = vrot.slane %v472_v45, 4  ;;  %v1054_v3 = vpop.eup %1053  ;;  %v1490_v24 = vadd.f32 1e-05, %v1465_v36  ;;  %v424_v33 = vadd.f32 %v423_v16, %v422_v20  ;;  %v1492_v55 = vmul.f32 0.25, %v517_v47 }
  0x65   :  { %v633_v56 = vrot.slane %v632_v54, 4  ;;  %1057 = vrcp.f32 %v207_v31  ;;  %v578_v10 = vrot.slane %v577_v49, 2  ;;  %v584_v11 = vrot.slane %v583_v6, 4 }
  0x66   :  { %v640_v13 = vsel %vm147_vm0, %v1486_v53, 0.0  ;;  %v1056_v9 = vpop.eup %1055  ;;  %v258_v2 = vadd.f32 %v257_v0, %v256_v39  ;;  %v326_v15 = vsel %vm324_vm6, %v325_v48, %v323_v27  ;;  %v428_v17 = vrot.slane %v427_v4, 4 }
  0x67   :  { %v1498_v18 = vmul.f32 0.25, %v525_v32  ;;  %1059 = vlog2.f32 %v368_v41  ;;  %v416_v50 = vmul.f32 0.25, %v415_v60  ;;  %v474_v19 = vadd.f32 %v473_v1, %v472_v45 }
  0x68   :  { %v483_v21 = vsel %vm147_vm0, %v1054_v3, 0.0  ;;  %v425_v29 = vmul.f32 0.25, %v424_v33  ;;  %v1503_v57 = vsub.f32 %v1400_v58, %v1492_v55  ;;  %v634_v20 = vadd.f32 %v633_v56, %v632_v54 }
  0x69   :  { %v641_v62 = vrot.slane %v640_v13, 4  ;;  %v359_v30 = vmul.f32 0.6931472, %v1056_v9  ;;  %v579_v31 = vmax.f32 %v577_v49, %v578_v10  ;;  %v585_v35 = vmax.f32 %v583_v6, %v584_v11 }
  0x6a   :  { %v696_v52 = vsel %vm147_vm0, %v1475_v8, -inf  ;;  %v484_v63 = vrot.slane %v483_v21, 4  ;;  %v1509_v38 = vsub.f32 %v1402_v59, %v1498_v18  ;;  %v635_v39 = vrot.slane %v634_v20, 2 }
  0x6b   :  { %v642_v42 = vadd.f32 %v641_v62, %v640_v13  ;;  %v1058_v44 = vpop.eup %1057  ;;  %v259_v46 = vrot.slane %v258_v2, 2  ;;  %v328_v16 = vadd.f32 1e-05, %v326_v15  ;;  %v429_v45 = vadd.f32 %v428_v17, %v427_v4 }
  0x6c   :  { %v475_v47 = vrot.slane %v474_v19, 2  ;;  %v529_v48 = vmul.f32 %v1503_v57, %v1503_v57  ;;  %v636_v49 = vadd.f32 %v635_v39, %v634_v20  ;;  %v697_v0 = vrot.slane %v696_v52, 4  ;;  %v1529_v20 = vld [vmem:[#allocation2 + $0xa] sm:$0xf] }
  0x6d   :  { %v643_v54 = vrot.slane %v642_v42, 2  ;;  %v1060_v27 = vpop.eup %1059  ;;  %v327_v32 = vadd.f32 1e-05, %v1467_v34  ;;  %v1514_v6 = vmul.f32 %v425_v29, %v416_v50  ;;  %v580_v41 = vrot.slane %v579_v31, 1 }
  0x6e   :  { %v586_v60 = vrot.slane %v585_v35, 2  ;;  %v371_v1 = vsub.f32 %v1349_v23, %v359_v30  ;;  %v485_v3 = vadd.f32 %v484_v63, %v483_v21  ;;  %v538_v4 = vmul.f32 %v1509_v38, %v1509_v38 }
  0x6f   :  { %v644_v33 = vadd.f32 %v643_v54, %v642_v42  ;;  %v1520_v56 = vmul.f32 %v1058_v44, %v1454_v14  ;;  %v1522_v10 = vadd.f32 %v259_v46, %v258_v2  ;;  %1061 = vrcp.f32 %v328_v16 }
  0x70   :  { %v698_v11 = vmax.f32 %v696_v52, %v697_v0  ;;  %v430_v13 = vrot.slane %v429_v45, 2  ;;  %v476_v34 = vadd.f32 %v475_v47, %v474_v19  ;;  %v530_v9 = vsel %vm147_vm0, %v529_v48, 0.0 }
  0x71   :  { %v637_v15 = vrot.slane %v636_v49, 1  ;;  %v581_v17 = vmax.f32 %v579_v31, %v580_v41  ;;  %v587_v50 = vmax.f32 %v585_v35, %v586_v60  ;;  %v645_v23 = vrot.slane %v644_v33, 1 }
  0x72   :  { %v704_v21 = vsel %vm147_vm0, %v1486_v53, -inf  ;;  %v373_v29 = vmul.f32 1.442695, %v371_v1  ;;  %1063 = vrsqrt.f32 %v1514_v6  ;;  %v486_v14 = vrot.slane %v485_v3, 2 }
  0x73   :  { %v539_v2 = vsel %vm147_vm0, %v538_v4, 0.0  ;;  %v370_v62 = vmul.f32 0.6931472, %v1060_v27  ;;  %v531_v30 = vrot.slane %v530_v9, 4  ;;  %v699_v19 = vrot.slane %v698_v11, 2 }
  0x74   :  { %v753_v52 = vsel %vm147_vm0, %v1529_v20, 0.0  ;;  %v431_v31 = vadd.f32 %v430_v13, %v429_v45  ;;  %v477_v35 = vrot.slane %v476_v34, 1  ;;  %v638_v63 = vadd.f32 %v637_v15, %v636_v49 }
  0x75   :  { %v705_v39 = vrot.slane %v704_v21, 4  ;;  %v1062_v42 = vpop.eup %1061  ;;  %v540_v44 = vrot.slane %v539_v2, 4  ;;  %v1534_v46 = vsub.f32 %v1400_v58, %v581_v17  ;;  %v588_v16 = vrot.slane %v587_v50, 1 }
  0x76   :  { %v646_v47 = vadd.f32 %v645_v23, %v644_v33  ;;  %v210_v48 = vsub.f32 1.0, %v1520_v56  ;;  %1065 = vpow2.f32 %v373_v29  ;;  %v487_v54 = vadd.f32 %v486_v14, %v485_v3 }
  0x77   :  { %v754_v0 = vrot.slane %v753_v52, 4  ;;  %v261_v27 = vrot.slane %v1522_v10, 1  ;;  %v372_v41 = vsub.f32 %v1358_v43, %v370_v62  ;;  %v532_v45 = vadd.f32 %v531_v30, %v530_v9 }
  0x78   :  { %v700_v60 = vmax.f32 %v698_v11, %v699_v19  ;;  %v1539_v49 = vpop.eup %1063  ;;  %v478_v4 = vadd.f32 %v477_v35, %v476_v34  ;;  %v1541_v13 = vmul.f32 0.25, %v638_v63  ;;  %v1543_v58 = vmul.f32 0.25, %v646_v47 }
  0x79   :  { %v706_v15 = vmax.f32 %v704_v21, %v705_v39  ;;  %v432_v33 = vrot.slane %v431_v31, 1  ;;  %v541_v17 = vadd.f32 %v540_v44, %v539_v2  ;;  %v589_v56 = vmax.f32 %v587_v50, %v588_v16 }
  0x7a   :  { %v591_v3 = vmul.f32 1.442695, %v1534_v46  ;;  %v330_v23 = vmul.f32 %v1062_v42, %v327_v32  ;;  %v385_v29 = vsub.f32 %v1297_v25, %v1299_v28  ;;  %v488_v43 = vrot.slane %v487_v54, 1 }
  0x7b   :  { %v755_v9 = vadd.f32 %v754_v0, %v753_v52  ;;  %v375_v11 = vsub.f32 %v371_v1, %v372_v41  ;;  %v437_v34 = vmul.f32 %v1539_v49, %v1514_v6  ;;  %v533_v14 = vrot.slane %v532_v45, 2 }
  0x7c   :  { %v701_v62 = vrot.slane %v700_v60, 1  ;;  %v1066_v30 = vpop.eup %1065  ;;  %1067 = vlog2.f32 %v478_v4  ;;  %v1552_v21 = vsub.f32 %v1475_v8, %v1541_v13  ;;  %v1556_v32 = vsub.f32 %v1486_v53, %v1543_v58 }
  0x7d   :  { %v707_v50 = vrot.slane %v706_v15, 2  ;;  %v433_v25 = vadd.f32 %v432_v33, %v431_v31  ;;  %v542_v28 = vrot.slane %v541_v17, 2  ;;  %v1559_v1 = vsub.f32 %v1402_v59, %v589_v56 }
  0x7e   :  { %1069 = vpow2.f32 %v591_v3  ;;  %v331_v2 = vsub.f32 1.0, %v330_v23  ;;  %v386_v19 = vand.u32 2147483647, %v385_v29  ;;  %v489_v52 = vadd.f32 %v488_v43, %v487_v54 }
  0x7f   :  { %v756_v35 = vrot.slane %v755_v9, 2  ;;  %v376_v63 = vmul.f32 %v1066_v30, %v375_v11  ;;  %v438_v39 = vmul.f32 %v1539_v49, %v437_v34  ;;  %v534_v42 = vadd.f32 %v533_v14, %v532_v45 }
  0x80   :  { %v702_v44 = vmax.f32 %v700_v60, %v701_v62  ;;  %1071 = vrcp.f32 %v1490_v24  ;;  %v650_v16 = vmul.f32 %v1552_v21, %v1552_v21  ;;  %v659_v31 = vmul.f32 %v1556_v32, %v1556_v32  ;;  %v1576_v24 = vld [vmem:[#allocation5 + $0xa] sm:$0xf] }
  0x81   :  { %v708_v59 = vmax.f32 %v706_v15, %v707_v50  ;;  %v1568_v47 = vadd.f32 %v261_v27, %v1522_v10  ;;  %v434_v0 = vmul.f32 0.25, %v433_v25  ;;  %v543_v54 = vadd.f32 %v542_v28, %v541_v17 }
  0x82   :  { %v602_v41 = vmul.f32 1.442695, %v1559_v1  ;;  %v1068_v4 = vpop.eup %1067  ;;  %v1571_v33 = vadd.f32 %v331_v2, %v210_v48  ;;  %v1574_v45 = vadd.f32 %v386_v19, %v1461_v40  ;;  %1073 = vlog2.f32 %v489_v52 }
  0x83   :  { %v757_v60 = vadd.f32 %v756_v35, %v755_v9  ;;  %v377_v15 = vsel %vm147_vm0, %v376_v63, 0.0  ;;  %v439_v3 = vmul.f32 0.5, %v438_v39  ;;  %v535_v10 = vrot.slane %v534_v42, 1 }
  0x84   :  { %v1070_v56 = vpop.eup %1069  ;;  %v1580_v27 = vsub.f32 %v1475_v8, %v702_v44  ;;  %v651_v17 = vsel %vm147_vm0, %v650_v16, 0.0  ;;  %v660_v48 = vsel %vm147_vm0, %v659_v31, 0.0  ;;  %v709_v23 = vrot.slane %v708_v59, 1 }
  0x85   :  { %v758_v29 = vrot.slane %v757_v60, 1  ;;  %v1584_v40 = vadd.f32 1e-05, %v434_v0  ;;  %v544_v43 = vrot.slane %v543_v54, 1  ;;  %1075 = vpow2.f32 %v602_v41 }
  0x86   :  { %v761_v9 = vsel %vm147_vm0, %v1576_v24, 0.0  ;;  %v1588_v11 = vpop.eup %1071  ;;  %v378_v34 = vrot.slane %v377_v15, 4  ;;  %v480_v14 = vmul.f32 0.6931472, %v1068_v4  ;;  %v593_v8 = vsel %vm147_vm0, %v1070_v56, 0.0 }
  0x87   :  { %1849 = vst [vmem:[#allocation13_spill] sm:$0xff] %v1588_v11  ;;  %v817_v62 = vsel %vm147_vm0, %v1529_v20, -inf  ;;  %v652_v30 = vrot.slane %v651_v17, 4  ;;  %v661_v50 = vrot.slane %v660_v48, 4  ;;  %v712_v25 = vmul.f32 1.442695, %v1580_v27 }
  0x88   :  { %v759_v28 = vadd.f32 %v758_v29, %v757_v60  ;;  %v1074_v2 = vpop.eup %1073  ;;  %v440_v19 = vsub.f32 1.5, %v439_v3  ;;  %v536_v52 = vadd.f32 %v535_v10, %v534_v42  ;;  %v710_v35 = vmax.f32 %v708_v59, %v709_v23 }
  0x89   :  { %v762_v63 = vrot.slane %v761_v9, 4  ;;  %v545_v44 = vadd.f32 %v544_v43, %v543_v54  ;;  %v818_v31 = vrot.slane %v817_v62, 4  ;;  %v1598_v0 = vsub.f32 %v1425_v26, %v480_v14 }
  0x8a   :  { %v1595_v16 = vmul.f32 0.25, %v759_v28  ;;  %v547_v4 = vmul.f32 %v1509_v38, %v1503_v57  ;;  %v594_v60 = vrot.slane %v593_v8, 4  ;;  %v653_v42 = vadd.f32 %v652_v30, %v651_v17 }
  0x8b   :  { %v1076_v56 = vpop.eup %1075  ;;  %v662_v59 = vadd.f32 %v661_v50, %v660_v48  ;;  %1077 = vpow2.f32 %v712_v25  ;;  %v763_v3 = vadd.f32 %v762_v63, %v761_v9  ;;  %v379_v10 = vadd.f32 %v378_v34, %v377_v15 }
  0x8c   :  { %1850 = vst [vmem:[#allocation14_spill] sm:$0xff] %v1595_v16  ;;  %v441_v54 = vmul.f32 %v1539_v49, %v440_v19  ;;  %vm443_vm7 = vcmp.eq.f32.partialorder %v1514_v6, inf  ;;  %v537_v23 = vmul.f32 0.25, %v536_v52  ;;  %v1607_v26 = vsub.f32 %v1486_v53, %v710_v35 }
  0x8d   :  { %v546_v29 = vmul.f32 0.25, %v545_v44  ;;  %v764_v43 = vrot.slane %v763_v3, 2  ;;  %v1611_v57 = vsub.f32 %v1529_v20, %v1595_v16  ;;  %v819_v38 = vmax.f32 %v817_v62, %v818_v31 }
  0x8e   :  { %v491_v17 = vmul.f32 0.6931472, %v1074_v2  ;;  %v494_v48 = vmul.f32 1.442695, %v1598_v0  ;;  %v548_v15 = vsel %vm147_vm0, %v547_v4, 0.0  ;;  %v604_v49 = vsel %vm147_vm0, %v1076_v56, 0.0 }
  0x8f   :  { %vm445_vm8 = vcmp.eq.f32.partialorder %v1514_v6, 0.0  ;;  %v595_v9 = vadd.f32 %v594_v60, %v593_v8  ;;  %v654_v34 = vrot.slane %v653_v42, 2  ;;  %v663_v53 = vrot.slane %v662_v59, 2 }
  0x90   :  { %v765_v14 = vadd.f32 %v764_v43, %v763_v3  ;;  %v723_v30 = vmul.f32 1.442695, %v1607_v26  ;;  %v771_v50 = vmul.f32 %v1611_v57, %v1611_v57  ;;  %v820_v25 = vrot.slane %v819_v38, 2 }
  0x91   :  { %v825_v62 = vsel %vm147_vm0, %v1576_v24, -inf  ;;  %v1078_v28 = vpop.eup %1077  ;;  %v442_v2 = vmul.f32 %v441_v54, %v1514_v6  ;;  %v1623_v19 = vmul.f32 %v546_v29, %v537_v23  ;;  %v549_v8 = vrot.slane %v548_v15, 4 }
  0x92   :  { %v766_v52 = vrot.slane %v765_v14, 1  ;;  %v826_v35 = vrot.slane %v825_v62, 4  ;;  %v605_v63 = vrot.slane %v604_v49, 4  ;;  %v772_v44 = vsel %vm147_vm0, %v771_v50, 0.0 }
  0x93   :  { %v821_v31 = vmax.f32 %v819_v38, %v820_v25  ;;  %v596_v4 = vrot.slane %v595_v9, 2  ;;  %v655_v60 = vadd.f32 %v654_v34, %v653_v42  ;;  %v664_v56 = vadd.f32 %v663_v53, %v662_v59 }
  0x94   :  { %v767_v3 = vadd.f32 %v766_v52, %v765_v14  ;;  %v714_v43 = vsel %vm147_vm0, %v1078_v28, 0.0  ;;  %1079 = vpow2.f32 %v723_v30  ;;  %v773_v51 = vrot.slane %v772_v44, 4 }
  0x95   :  { %v822_v41 = vrot.slane %v821_v31, 1  ;;  %v380_v39 = vrot.slane %v379_v10, 2  ;;  %v493_v54 = vsub.f32 %v1444_v7, %v491_v17  ;;  %1081 = vrsqrt.f32 %v1623_v19 }
  0x96   :  { %v827_v23 = vmax.f32 %v825_v62, %v826_v35  ;;  %v550_v29 = vadd.f32 %v549_v8, %v548_v15  ;;  %v1629_v36 = vmul.f32 0.25, %v767_v3  ;;  %v774_v50 = vadd.f32 %v773_v51, %v772_v44 }
  0x97   :  { %v823_v38 = vmax.f32 %v821_v31, %v822_v41  ;;  %v444_v42 = vsel %vm443_vm7, %v1514_v6, %v442_v2  ;;  %v597_v59 = vadd.f32 %v596_v4, %v595_v9  ;;  %v606_v34 = vadd.f32 %v605_v63, %v604_v49 }
  0x98   :  { %1851 = vst [vmem:[#allocation15_spill] sm:$0xff] %v1629_v36  ;;  %v715_v53 = vrot.slane %v714_v43, 4  ;;  %v656_v14 = vrot.slane %v655_v60, 1  ;;  %v665_v30 = vrot.slane %v664_v56, 1  ;;  %v1636_v7 = vsub.f32 %v1576_v24, %v1629_v36 }
  0x99   :  { %v1639_v17 = vsub.f32 %v1529_v20, %v823_v38  ;;  %v1641_v15 = vadd.f32 %v380_v39, %v379_v10  ;;  %1083 = vpow2.f32 %v494_v48  ;;  %v775_v51 = vrot.slane %v774_v50, 2 }
  0x9a   :  { %v828_v41 = vrot.slane %v827_v23, 2  ;;  %v1080_v25 = vpop.eup %1079  ;;  %v1852_v62 = vand.u32 2147483648, %v1514_v6  ;;  %v496_v9 = vsub.f32 %v1598_v0, %v493_v54  ;;  %v551_v28 = vrot.slane %v550_v29, 2 }
  0x9b   :  { %v780_v2 = vmul.f32 %v1636_v7, %v1636_v7  ;;  %v1650_v52 = vpop.eup %1081  ;;  %v607_v20 = vrot.slane %v606_v34, 2  ;;  %v716_v39 = vadd.f32 %v715_v53, %v714_v43  ;;  %v833_v48 = vmul.f32 1.442695, %v1639_v17 }
  0x9c   :  { %v447_v49 = vsel %vm445_vm8, %v1852_v62, %v444_v42  ;;  %v829_v10 = vmax.f32 %v827_v23, %v828_v41  ;;  %v598_v35 = vrot.slane %v597_v59, 1  ;;  %v657_v8 = vadd.f32 %v656_v14, %v655_v60  ;;  %v1666_v62 = vld [vmem:[#allocation5 + $0xc] sm:$0xf] }
  0x9d   :  { %v666_v63 = vadd.f32 %v665_v30, %v664_v56  ;;  %v781_v44 = vsel %vm147_vm0, %v780_v2, 0.0  ;;  %v725_v6 = vsel %vm147_vm0, %v1080_v25, 0.0  ;;  %v776_v31 = vadd.f32 %v775_v51, %v774_v50  ;;  %v1661_v50 = vld [vmem:[#allocation2 + $0xc] sm:$0xf] }
  0x9e   :  { %v782_v0 = vrot.slane %v781_v44, 4  ;;  %v830_v4 = vrot.slane %v829_v10, 1  ;;  %v449_v3 = vadd.f32 1e-05, %v447_v49  ;;  %v1655_v54 = vadd.f32 %v551_v28, %v550_v29 }
  0x9f   :  { %v558_v38 = vmul.f32 %v1650_v52, %v1623_v19  ;;  %1085 = vpow2.f32 %v833_v48  ;;  %v1084_v43 = vpop.eup %1083  ;;  %v1659_v23 = vadd.f32 %v607_v20, %v606_v34  ;;  %v717_v42 = vrot.slane %v716_v39, 2 }
  0xa0   :  { %v783_v60 = vadd.f32 %v782_v0, %v781_v44  ;;  %v831_v56 = vmax.f32 %v829_v10, %v830_v4  ;;  %v599_v53 = vadd.f32 %v598_v35, %v597_v59  ;;  %v658_v14 = vmul.f32 0.25, %v657_v8 }
  0xa1   :  { %v667_v30 = vmul.f32 0.25, %v666_v63  ;;  %v726_v41 = vrot.slane %v725_v6, 4  ;;  %v777_v51 = vrot.slane %v776_v31, 1  ;;  %v874_v34 = vsel %vm147_vm0, %v1661_v50, 0.0 }
  0xa2   :  { %v784_v25 = vrot.slane %v783_v60, 2  ;;  %v1664_v29 = vsub.f32 %v1576_v24, %v831_v56  ;;  %1087 = vrcp.f32 %v449_v3  ;;  %v497_v49 = vmul.f32 %v1084_v43, %v496_v9 }
  0xa3   :  { %v553_v28 = vrot.slane %v1655_v54, 1  ;;  %v559_v59 = vmul.f32 %v1650_v52, %v558_v38  ;;  %v609_v2 = vrot.slane %v1659_v23, 1  ;;  %v718_v20 = vadd.f32 %v717_v42, %v716_v39 }
  0xa4   :  { %v785_v10 = vadd.f32 %v784_v25, %v783_v60  ;;  %v844_v48 = vmul.f32 1.442695, %v1664_v29  ;;  %1089 = vlog2.f32 %v599_v53  ;;  %v1674_v24 = vmul.f32 %v667_v30, %v658_v14 }
  0xa5   :  { %v1086_v35 = vpop.eup %1085  ;;  %v875_v8 = vrot.slane %v874_v34, 4  ;;  %v882_v63 = vsel %vm147_vm0, %v1666_v62, 0.0  ;;  %v727_v44 = vadd.f32 %v726_v41, %v725_v6  ;;  %v778_v9 = vadd.f32 %v777_v51, %v776_v31 }
  0xa6   :  { %v786_v0 = vrot.slane %v785_v10, 1  ;;  %v835_v4 = vsel %vm147_vm0, %v1086_v35, 0.0  ;;  %1091 = vpow2.f32 %v844_v48  ;;  %v883_v39 = vrot.slane %v882_v63, 4 }
  0xa7   :  { %v836_v3 = vrot.slane %v835_v4, 4  ;;  %v876_v38 = vadd.f32 %v875_v8, %v874_v34  ;;  %v719_v43 = vrot.slane %v718_v20, 1  ;;  %v938_v60 = vsel %vm147_vm0, %v1661_v50, -inf }
  0xa8   :  { %v787_v42 = vadd.f32 %v786_v0, %v785_v10  ;;  %v946_v56 = vsel %vm147_vm0, %v1666_v62, -inf  ;;  %v1683_v53 = vpop.eup %1087  ;;  %v884_v31 = vadd.f32 %v883_v39, %v882_v63  ;;  %v939_v30 = vrot.slane %v938_v60, 4 }
  0xa9   :  { %v837_v14 = vadd.f32 %v836_v3, %v835_v4  ;;  %v877_v6 = vrot.slane %v876_v38, 2  ;;  %v668_v41 = vmul.f32 %v1556_v32, %v1552_v21  ;;  %v728_v51 = vrot.slane %v727_v44, 2 }
  0xaa   :  { %v779_v25 = vmul.f32 0.25, %v778_v9  ;;  %v947_v34 = vrot.slane %v946_v56, 4  ;;  %v1090_v48 = vpop.eup %1089  ;;  %v788_v10 = vmul.f32 0.25, %v787_v42  ;;  %v885_v0 = vrot.slane %v884_v31, 2 }
  0xab   :  { %v838_v35 = vrot.slane %v837_v14, 2  ;;  %v878_v8 = vadd.f32 %v877_v6, %v876_v38  ;;  %v1689_v16 = vsel %vm147_vm0, %v497_v49, 0.0  ;;  %1093 = vrsqrt.f32 %v1674_v24 }
  0xac   :  { %v940_v63 = vmax.f32 %v938_v60, %v939_v30  ;;  %v1092_v4 = vpop.eup %1091  ;;  %v720_v3 = vadd.f32 %v719_v43, %v718_v20  ;;  %v886_v32 = vadd.f32 %v885_v0, %v884_v31  ;;  %v1693_v9 = vadd.f32 %v553_v28, %v1655_v54 }
  0xad   :  { %v839_v39 = vadd.f32 %v838_v35, %v837_v14  ;;  %v879_v21 = vrot.slane %v878_v8, 1  ;;  %v560_v42 = vmul.f32 0.5, %v559_v59  ;;  %v610_v38 = vadd.f32 %v609_v2, %v1659_v23 }
  0xae   :  { %v948_v6 = vmax.f32 %v946_v56, %v947_v34  ;;  %v669_v11 = vsel %vm147_vm0, %v668_v41, 0.0  ;;  %v729_v36 = vadd.f32 %v728_v51, %v727_v44  ;;  %v1697_v49 = vmul.f32 %v788_v10, %v779_v25 }
  0xaf   :  { %v840_v61 = vrot.slane %v839_v39, 1  ;;  %v846_v60 = vsel %vm147_vm0, %v1092_v4, 0.0  ;;  %v880_v30 = vadd.f32 %v879_v21, %v878_v8  ;;  %v887_v20 = vrot.slane %v886_v32, 1 }
  0xb0   :  { %v941_v43 = vrot.slane %v940_v63, 2  ;;  %v601_v14 = vmul.f32 0.6931472, %v1090_v48  ;;  %1095 = vlog2.f32 %v720_v3  ;;  %v847_v54 = vrot.slane %v846_v60, 4 }
  0xb1   :  { %v841_v31 = vadd.f32 %v840_v61, %v839_v39  ;;  %v1700_v28 = vpop.eup %1093  ;;  %v1702_v59 = vmul.f32 0.25, %v880_v30  ;;  %v888_v23 = vadd.f32 %v887_v20, %v886_v32  ;;  %v949_v56 = vrot.slane %v948_v6, 2 }
  0xb2   :  { %v942_v2 = vmax.f32 %v940_v63, %v941_v43  ;;  %v561_v44 = vsub.f32 1.5, %v560_v42  ;;  %1097 = vlog2.f32 %v610_v38  ;;  %v730_v41 = vrot.slane %v729_v36, 1 }
  0xb3   :  { %v848_v51 = vadd.f32 %v847_v54, %v846_v60  ;;  %1099 = vrsqrt.f32 %v1697_v49  ;;  %v1705_v25 = vmul.f32 0.25, %v888_v23  ;;  %v1709_v34 = vsub.f32 %v1661_v50, %v1702_v59 }
  0xb4   :  { %v943_v61 = vrot.slane %v942_v2, 1  ;;  %v1712_v48 = vsub.f32 %v1534_v46, %v601_v14  ;;  %v670_v10 = vrot.slane %v669_v11, 4  ;;  %v950_v8 = vmax.f32 %v948_v6, %v949_v56 }
  0xb5   :  { %v849_v35 = vrot.slane %v848_v51, 2  ;;  %v679_v0 = vmul.f32 %v1700_v28, %v1674_v24  ;;  %1101 = vlog2.f32 %v841_v31  ;;  %v1718_v63 = vsub.f32 %v1666_v62, %v1705_v25 }
  0xb6   :  { %v892_v4 = vmul.f32 %v1709_v34, %v1709_v34  ;;  %v1096_v3 = vpop.eup %1095  ;;  %v562_v46 = vmul.f32 %v1650_v52, %v561_v44  ;;  %v731_v21 = vadd.f32 %v730_v41, %v729_v36  ;;  %vm564_vm9 = vcmp.eq.f32.partialorder %v1623_v19, inf }
  0xb7   :  { %v850_v32 = vadd.f32 %v849_v35, %v848_v51  ;;  %v901_v38 = vmul.f32 %v1718_v63, %v1718_v63  ;;  %v944_v6 = vmax.f32 %v942_v2, %v943_v61  ;;  %v615_v30 = vmul.f32 1.442695, %v1712_v48 }
  0xb8   :  { %v893_v42 = vsel %vm147_vm0, %v892_v4, 0.0  ;;  %v1098_v60 = vpop.eup %1097  ;;  %v951_v14 = vrot.slane %v950_v8, 1  ;;  %vm566_vm10 = vcmp.eq.f32.partialorder %v1623_v19, 0.0  ;;  %v567_v36 = vand.u32 2147483648, %v1623_v19 }
  0xb9   :  { %v851_v20 = vrot.slane %v850_v32, 1  ;;  %v894_v43 = vrot.slane %v893_v42, 4  ;;  %v1729_v31 = vpop.eup %1099  ;;  %v671_v52 = vadd.f32 %v670_v10, %v669_v11  ;;  %v680_v54 = vmul.f32 %v1700_v28, %v679_v0 }
  0xba   :  { %v902_v23 = vsel %vm147_vm0, %v901_v38, 0.0  ;;  %v563_v56 = vmul.f32 %v562_v46, %v1623_v19  ;;  %v722_v2 = vmul.f32 0.6931472, %v1096_v3  ;;  %1103 = vlog2.f32 %v731_v21 }
  0xbb   :  { %v895_v44 = vadd.f32 %v894_v43, %v893_v42  ;;  %v1102_v41 = vpop.eup %1101  ;;  %v612_v51 = vmul.f32 0.6931472, %v1098_v60  ;;  %v852_v61 = vadd.f32 %v851_v20, %v850_v32  ;;  %v903_v35 = vrot.slane %v902_v23, 4 }
  0xbc   :  { %v1737_v4 = vsub.f32 %v1661_v50, %v944_v6  ;;  %1105 = vpow2.f32 %v615_v30  ;;  %v800_v11 = vmul.f32 %v1729_v31, %v1697_v49  ;;  %v952_v0 = vmax.f32 %v950_v8, %v951_v14 }
  0xbd   :  { %v896_v10 = vrot.slane %v895_v44, 2  ;;  %v681_v39 = vmul.f32 0.5, %v680_v54  ;;  %v789_v46 = vmul.f32 %v1636_v7, %v1611_v57  ;;  %v904_v3 = vadd.f32 %v903_v35, %v902_v23 }
  0xbe   :  { %v954_v21 = vmul.f32 1.442695, %v1737_v4  ;;  %v734_v42 = vsub.f32 %v1580_v27, %v722_v2  ;;  %v843_v32 = vmul.f32 0.6931472, %v1102_v41  ;;  %v1746_v50 = vsub.f32 %v1666_v62, %v952_v0 }
  0xbf   :  { %v897_v38 = vadd.f32 %v896_v10, %v895_v44  ;;  %v565_v6 = vsel %vm564_vm9, %v1623_v19, %v563_v56  ;;  %v672_v60 = vrot.slane %v671_v52, 2  ;;  %1107 = vlog2.f32 %v852_v61 }
  0xc0   :  { %v905_v8 = vrot.slane %v904_v3, 2  ;;  %v1104_v30 = vpop.eup %1103  ;;  %v801_v57 = vmul.f32 %v1729_v31, %v800_v11  ;;  %1109 = vpow2.f32 %v954_v21  ;;  %v965_v20 = vmul.f32 1.442695, %v1746_v50 }
  0xc1   :  { %v898_v7 = vrot.slane %v897_v38, 1  ;;  %v614_v27 = vsub.f32 %v1559_v1, %v612_v51  ;;  %v682_v43 = vsub.f32 1.5, %v681_v39  ;;  %v790_v62 = vsel %vm147_vm0, %v789_v46, 0.0 }
  0xc2   :  { %v906_v14 = vadd.f32 %v905_v8, %v904_v3  ;;  %v1106_v54 = vpop.eup %1105  ;;  %v736_v23 = vmul.f32 1.442695, %v734_v42  ;;  %v855_v56 = vsub.f32 %v1639_v17, %v843_v32  ;;  %1111 = vpow2.f32 %v965_v20 }
  0xc3   :  { %v899_v2 = vadd.f32 %v898_v7, %v897_v38  ;;  %v1757_v44 = vmul.f32 0.25, %v1693_v9  ;;  %v733_v41 = vmul.f32 0.6931472, %v1104_v30  ;;  %v910_v35 = vmul.f32 %v1718_v63, %v1709_v34 }
  0xc4   :  { %v907_v61 = vrot.slane %v906_v14, 1  ;;  %v1763_v1 = vmul.f32 %v1683_v53, %v1584_v40  ;;  %v1853_v39 = vrot.slane %v1689_v16, 4  ;;  %v568_v17 = vsel %vm566_vm10, %v567_v36, %v565_v6 }
  0xc5   :  { %v802_v11 = vmul.f32 0.5, %v801_v57  ;;  %v1108_v9 = vpop.eup %1107  ;;  %v617_v10 = vsub.f32 %v1712_v48, %v614_v27  ;;  %v791_v0 = vrot.slane %v790_v62, 4  ;;  %v900_v46 = vmul.f32 0.25, %v899_v2 }
  0xc6   :  { %v1768_v51 = vadd.f32 %v1853_v39, %v1689_v16  ;;  %v908_v3 = vadd.f32 %v907_v61, %v906_v14  ;;  %v1110_v34 = vpop.eup %1109  ;;  %v673_v63 = vadd.f32 %v672_v60, %v671_v52  ;;  %v683_v40 = vmul.f32 %v1700_v28, %v682_v43 }
  0xc7   :  { %1113 = vpow2.f32 %v736_v23  ;;  %v857_v53 = vmul.f32 1.442695, %v855_v56  ;;  %v735_v21 = vsub.f32 %v1607_v26, %v733_v41  ;;  %v911_v32 = vsel %vm147_vm0, %v910_v35, 0.0 }
  0xc8   :  { %v909_v16 = vmul.f32 0.25, %v908_v3  ;;  %v956_v19 = vsel %vm147_vm0, %v1110_v34, 0.0  ;;  %v1112_v36 = vpop.eup %1111  ;;  %v570_v38 = vadd.f32 1e-05, %v568_v17  ;;  %v803_v6 = vsub.f32 1.5, %v802_v11 }
  0xc9   :  { %v854_v48 = vmul.f32 0.6931472, %v1108_v9  ;;  %v957_v8 = vrot.slane %v956_v19, 4  ;;  %v618_v30 = vmul.f32 %v1106_v54, %v617_v10  ;;  %v792_v57 = vadd.f32 %v791_v0, %v790_v62 }
  0xca   :  { %v1777_v7 = vmul.f32 %v909_v16, %v900_v46  ;;  %v967_v28 = vsel %vm147_vm0, %v1112_v36, 0.0  ;;  %1115 = vpow2.f32 %v857_v53  ;;  %v912_v52 = vrot.slane %v911_v32, 4 }
  0xcb   :  { %v958_v60 = vadd.f32 %v957_v8, %v956_v19  ;;  %v968_v26 = vrot.slane %v967_v28, 4  ;;  %v674_v20 = vrot.slane %v673_v63, 1  ;;  %v684_v27 = vmul.f32 %v683_v40, %v1674_v24 }
  0xcc   :  { %v738_v43 = vsub.f32 %v734_v42, %v735_v21  ;;  %1117 = vrsqrt.f32 %v1777_v7  ;;  %vm685_vm11 = vcmp.eq.f32.partialorder %v1674_v24, inf  ;;  %v804_v54 = vmul.f32 %v1729_v31, %v803_v6 }
  0xcd   :  { %v1114_v14 = vpop.eup %1113  ;;  %v856_v62 = vsub.f32 %v1664_v29, %v854_v48  ;;  %v959_v23 = vrot.slane %v958_v60, 2  ;;  %v501_v2 = vrot.slane %v1768_v51, 2  ;;  %1119 = vrcp.f32 %v570_v38 }
  0xce   :  { %v793_v41 = vrot.slane %v792_v57, 2  ;;  %v969_v61 = vadd.f32 %v968_v26, %v967_v28  ;;  %v619_v35 = vsel %vm147_vm0, %v618_v30, 0.0  ;;  %v688_v39 = vand.u32 2147483648, %v1674_v24 }
  0xcf   :  { %v913_v42 = vadd.f32 %v912_v52, %v911_v32  ;;  %v960_v17 = vadd.f32 %v959_v23, %v958_v60  ;;  %v686_v11 = vsel %vm685_vm11, %v1674_v24, %v684_v27  ;;  %vm687_vm12 = vcmp.eq.f32.partialorder %v1674_v24, 0.0 }
  0xd0   :  { %v739_v9 = vmul.f32 %v1114_v14, %v738_v43  ;;  %v970_v31 = vrot.slane %v969_v61, 2  ;;  %v1116_v10 = vpop.eup %1115  ;;  %v675_v29 = vadd.f32 %v674_v20, %v673_v63  ;;  %v805_v0 = vmul.f32 %v804_v54, %v1697_v49 }
  0xd1   :  { %v859_v46 = vsub.f32 %v855_v56, %v856_v62  ;;  %v961_v3 = vrot.slane %v960_v17, 1  ;;  %v620_v40 = vrot.slane %v619_v35, 4  ;;  %v794_v53 = vadd.f32 %v793_v41, %v792_v57 }
  0xd2   :  { %v1118_v34 = vpop.eup %1117  ;;  %vm806_vm13 = vcmp.eq.f32.partialorder %v1697_v49, inf  ;;  %v971_v21 = vadd.f32 %v970_v31, %v969_v61  ;;  %v689_v16 = vsel %vm687_vm12, %v688_v39, %v686_v11  ;;  %v914_v32 = vrot.slane %v913_v42, 2 }
  0xd3   :  { %v921_v19 = vmul.f32 %v1118_v34, %v1777_v7  ;;  %v962_v36 = vadd.f32 %v961_v3, %v960_v17  ;;  %v1120_v24 = vpop.eup %1119  ;;  %v740_v38 = vsel %vm147_vm0, %v739_v9, 0.0  ;;  %vm808_vm14 = vcmp.eq.f32.partialorder %v1697_v49, 0.0 }
  0xd4   :  { %v809_v63 = vand.u32 2147483648, %v1697_v49  ;;  %v972_v56 = vrot.slane %v971_v21, 1  ;;  %v807_v6 = vsel %vm806_vm13, %v1697_v49, %v805_v0  ;;  %v860_v48 = vmul.f32 %v1116_v10, %v859_v46 }
  0xd5   :  { %v922_v8 = vmul.f32 %v1118_v34, %v921_v19  ;;  %1121 = vlog2.f32 %v962_v36  ;;  %v621_v30 = vadd.f32 %v620_v40, %v619_v35  ;;  %v691_v57 = vadd.f32 1e-05, %v689_v16 }
  0xd6   :  { %v795_v28 = vrot.slane %v794_v53, 1  ;;  %v973_v52 = vadd.f32 %v972_v56, %v971_v21  ;;  %v1854_v60 = vsub.f32 %v1372_v5, %v1378_v12  ;;  %v741_v20 = vrot.slane %v740_v38, 4 }
  0xd7   :  { %v915_v27 = vadd.f32 %v914_v32, %v913_v42  ;;  %v923_v43 = vmul.f32 0.5, %v922_v8  ;;  %v1855_v14 = vrot.slane %v1641_v15, 1  ;;  %v569_v62 = vadd.f32 1e-05, %v1757_v44 }
  0xd8   :  { %v507_v26 = vand.u32 2147483647, %v1854_v60  ;;  %v810_v23 = vsel %vm808_vm14, %v809_v63, %v807_v6  ;;  %1123 = vlog2.f32 %v973_v52  ;;  %v502_v41 = vadd.f32 %v501_v2, %v1768_v51 }
  0xd9   :  { %v383_v54 = vadd.f32 %v1855_v14, %v1641_v15  ;;  %v676_v61 = vmul.f32 0.25, %v675_v29  ;;  %v861_v35 = vsel %vm147_vm0, %v860_v48, 0.0  ;;  %v924_v5 = vsub.f32 1.5, %v923_v43  ;;  %v1856_v43 = vld [vmem:[#allocation11_spill] sm:$0xff] }
  0xda   :  { %v452_v12 = vsub.f32 1.0, %v1763_v1  ;;  %v622_v39 = vrot.slane %v621_v30, 2  ;;  %1125 = vrcp.f32 %v691_v57  ;;  %v796_v42 = vadd.f32 %v795_v28, %v794_v53 }
  0xdb   :  { %v1122_v17 = vpop.eup %1121  ;;  %v742_v11 = vadd.f32 %v741_v20, %v740_v38  ;;  %v812_v15 = vadd.f32 1e-05, %v810_v23  ;;  %v916_v9 = vrot.slane %v915_v27, 1  ;;  %v925_v44 = vmul.f32 %v1118_v34, %v924_v5 }
  0xdc   :  { %v862_v31 = vrot.slane %v861_v35, 4  ;;  %vm927_vm15 = vcmp.eq.f32.partialorder %v1777_v7, inf  ;;  %v930_v49 = vand.u32 2147483648, %v1777_v7  ;;  %v964_v51 = vmul.f32 0.6931472, %v1122_v17 }
  0xdd   :  { %v503_v2 = vrot.slane %v502_v41, 1  ;;  %v690_v10 = vadd.f32 1e-05, %v676_v61  ;;  %v926_v29 = vmul.f32 %v925_v44, %v1777_v7  ;;  %vm929_vm1 = vcmp.eq.f32.partialorder %v1777_v7, 0.0  ;;  %v1861_v44 = vld [vmem:[#allocation12_spill] sm:$0xff] }
  0xde   :  { %v1124_v1 = vpop.eup %1123  ;;  %v572_v0 = vmul.f32 %v1120_v24, %v569_v62  ;;  %v623_v46 = vadd.f32 %v622_v39, %v621_v30  ;;  %v797_v3 = vmul.f32 0.25, %v796_v42  ;;  %v976_v40 = vsub.f32 %v1737_v4, %v964_v51  ;;  %v1859_v42 = vld [vmem:[#allocation14_spill] sm:$0xff] }
  0xdf   :  { %v743_v53 = vrot.slane %v742_v11, 2  ;;  %1127 = vrcp.f32 %v812_v15  ;;  %v928_v34 = vsel %vm927_vm15, %v1777_v7, %v926_v29  ;;  %v975_v21 = vmul.f32 0.6931472, %v1124_v1  ;;  %v1860_v15 = vld [vmem:[#allocation13_spill] sm:$0xff] }
  0xe0   :  { %v1126_v16 = vpop.eup %1125  ;;  %v863_v32 = vadd.f32 %v862_v31, %v861_v35  ;;  %v917_v19 = vadd.f32 %v916_v9, %v915_v27  ;;  %v931_v36 = vsel %vm929_vm1, %v930_v49, %v928_v34  ;;  %v978_v38 = vmul.f32 1.442695, %v976_v40 }
  0xe1   :  { %v384_v63 = vadd.f32 %v383_v54, %v1568_v47  ;;  %v627_v56 = vsub.f32 %v1492_v55, %v1498_v18  ;;  %v933_v24 = vadd.f32 1e-05, %v931_v36  ;;  %v977_v6 = vsub.f32 %v1746_v50, %v975_v21 }
  0xe2   :  { %v453_v4 = vadd.f32 %v452_v12, %v1571_v33  ;;  %v504_v48 = vadd.f32 %v503_v2, %v502_v41  ;;  %v573_v8 = vsub.f32 1.0, %v572_v0  ;;  %1129 = vpow2.f32 %v978_v38 }
  0xe3   :  { %v624_v7 = vrot.slane %v623_v46, 1  ;;  %v693_v30 = vmul.f32 %v1126_v16, %v690_v10  ;;  %v744_v57 = vadd.f32 %v743_v53, %v742_v11  ;;  %1131 = vrcp.f32 %v933_v24 }
  0xe4   :  { %v128_v28 = vadd.f32 1e-05, %v1436_v22  ;;  %v811_v52 = vadd.f32 1e-05, %v797_v3  ;;  %v864_v60 = vrot.slane %v863_v32, 2  ;;  %v918_v47 = vmul.f32 0.25, %v917_v19 }
  0xe5   :  { %v1128_v20 = vpop.eup %1127  ;;  %v508_v55 = vadd.f32 %v507_v26, %v1574_v45  ;;  %v628_v18 = vand.u32 2147483647, %v627_v56  ;;  %v748_v50 = vsub.f32 %v1541_v13, %v1543_v58  ;;  %v980_v33 = vsub.f32 %v976_v40, %v977_v6  ;;  %v1858_v58 = vld [vmem:[#allocation15_spill] sm:$0xff] }
  0xe6   :  { %v119_v27 = vadd.f32 1e-05, %v1392_v37  ;;  %v1857_v14 = vrot.slane %v1856_v43, 4  ;;  %v505_v62 = vadd.f32 %v504_v48, %v384_v63  ;;  %v574_v23 = vadd.f32 %v573_v8, %v453_v4 }
  0xe7   :  { %v625_v22 = vadd.f32 %v624_v7, %v623_v46  ;;  %v694_v41 = vsub.f32 1.0, %v693_v30  ;;  %v745_v61 = vrot.slane %v744_v57, 1  ;;  %1133 = vrcp.f32 %v128_v28 }
  0xe8   :  { %v139_v54 = vadd.f32 %v1857_v14, %v1856_v43  ;;  %v1130_v35 = vpop.eup %1129  ;;  %v814_v5 = vmul.f32 %v1128_v20, %v811_v52  ;;  %v865_v45 = vadd.f32 %v864_v60, %v863_v32  ;;  %v932_v26 = vadd.f32 1e-05, %v918_v47 }
  0xe9   :  { %v1132_v12 = vpop.eup %1131  ;;  %v629_v39 = vadd.f32 %v628_v18, %v508_v55  ;;  %v749_v13 = vand.u32 2147483647, %v748_v50  ;;  %v869_v37 = vsub.f32 %v1859_v42, %v1858_v58  ;;  %v981_v17 = vmul.f32 %v1130_v35, %v980_v33 }
  0xea   :  { %v44_v11 = vlaneseq  ;;  %v122_v9 = vmul.f32 %v1860_v15, %v119_v27  ;;  %v125_v31 = vmul.f32 2.0, %v1861_v44  ;;  %v140_v49 = vrot.slane %v139_v54, 2 }
  0xeb   :  { %v626_v51 = vadd.f32 %v625_v22, %v505_v62  ;;  %v695_v2 = vadd.f32 %v694_v41, %v574_v23  ;;  %v746_v10 = vadd.f32 %v745_v61, %v744_v57  ;;  %v982_v29 = vsel %vm147_vm0, %v981_v17, 0.0 }
  0xec   :  { %v815_v1 = vsub.f32 1.0, %v814_v5  ;;  %v866_v0 = vrot.slane %v865_v45, 1  ;;  %v935_v46 = vmul.f32 %v1132_v12, %v932_v26  ;;  %v983_v3 = vrot.slane %v982_v29, 4 }
  0xed   :  { %v750_v40 = vadd.f32 %v749_v13, %v629_v39  ;;  %v870_v53 = vand.u32 2147483647, %v869_v37  ;;  %v990_v34 = vsub.f32 %v1702_v59, %v1705_v25  ;;  %v1134_v21 = vpop.eup %1133  ;;  %v45_v16 = vand.u32 127, %v44_v11 }
  0xee   :  { %v123_v32 = vadd.f32 1.0, %v122_v9  ;;  %v126_v19 = vadd.f32 1e-05, %v125_v31  ;;  %v984_v36 = vadd.f32 %v983_v3, %v982_v29  ;;  %v141_v38 = vadd.f32 %v140_v49, %v139_v54 }
  0xef   :  { %v747_v63 = vadd.f32 %v746_v10, %v626_v51  ;;  %v816_v56 = vadd.f32 %v815_v1, %v695_v2  ;;  %v867_v24 = vadd.f32 %v866_v0, %v865_v45  ;;  %v936_v6 = vsub.f32 1.0, %v935_v46 }
  0xf0   :  { %v985_v4 = vrot.slane %v984_v36, 2  ;;  %v871_v48 = vadd.f32 %v870_v53, %v750_v40  ;;  %v991_v8 = vand.u32 2147483647, %v990_v34  ;;  %vm49_vm2 = vcmp.lt.s32.totalorder %v45_v16, 8 }
  0xf1   :  { %v124_v7 = vmul.f32 0.5, %v123_v32  ;;  %v130_v30 = vmul.f32 %v1134_v21, %v126_v19  ;;  %v142_v28 = vrot.slane %v141_v38, 1  ;;  %v868_v52 = vadd.f32 %v867_v24, %v747_v63 }
  0xf2   :  { %v986_v57 = vadd.f32 %v985_v4, %v984_v36  ;;  %v937_v59 = vadd.f32 %v936_v6, %v816_v56  ;;  %v1217_v60 = vmov 0.0   ;;  %v992_v20 = vadd.f32 %v991_v8, %v871_v48 }
  0xf3   :  { %v1024_v47 = vsel %vm49_vm2, 1.0, %v1217_v60  ;;  %v133_v55 = vmul.f32 %v130_v30, %v124_v7  ;;  %v143_v50 = vadd.f32 %v142_v28, %v141_v38  ;;  %vm996_vm3 = vcmask 1040384  }
  0xf4   :  { %v987_v25 = vrot.slane %v986_v57, 1  ;;  %v993_v27 = vmul.f32 %v1024_v47, %v937_v59  ;;  %v995_v43 = vmul.f32 %v1024_v47, %v992_v20  ;;  %vm998_vm4 = vcmask 1041408  }
  0xf5   :  { %v134_v14 = vmul.f32 %v1024_v47, %v133_v55  ;;  %v144_v62 = vmul.f32 %v1024_v47, %v143_v50  ;;  %vm1000_vm5 = vcmask 1042432   ;;  %vm1003_vm6 = vcmask 1044480  }
  0xf6   :  { %v988_v18 = vadd.f32 %v987_v25, %v986_v57 }
  0xf8   :  { %v989_v33 = vadd.f32 %v988_v18, %v868_v52 }
  0xfa   :  { %v994_v54 = vmul.f32 %v1024_v47, %v989_v33 }
  0xfc   :  { %v997_v23 = vsel %vm996_vm3, %v993_v27, %v994_v54 }
  0xfd   :  { %v999_v22 = vsel %vm998_vm4, %v997_v23, %v995_v43 }
  0xfe   :  { %v1001_v41 = vsel %vm1000_vm5, %v999_v22, %v134_v14 }
  0xff   :  { %v1002_v61 = vsel %vm147_vm0, %v1001_v41, %v144_v62 }
 0x100   :  { %v1004_v35 = vsel %vm1003_vm6, %v1002_v61, 0.0 }
 0x101   :  { %1005 = vst [vmem:[#allocation7] sm:$0xff] %v1004_v35 }
 0x102   :  { %1016 = dma.vmem_to_hbm [thread:$0]  %s1012_s1, 128, %s1014_s23, [#allocation4]  }
 0x103   :  { %1211 = dma.done.wait [#allocation4], 128  }
 0x104   :  { %1212 = vsyncadd [#allocation4], 4294967168 }
 0x105   :  { %1021 = vsyncpa [#allocation3], 1 }
 0x106   :  { %1022 = vsyncpa [#allocation6], 1 }
 0x107   :  { %1023 = vsyncpa [#allocation4], 1 }

</bundles_post_ra>
